<compile_context>
chip_gen: v5e
topology: v5e:2x2
jax: 0.10.0
libtpu: 0.0.40
codegen_flags: <defaults>
</compile_context>

<pallas_src>
import jax
import jax.numpy as jnp
from jax.experimental import pallas as pl
from jax.experimental.pallas import tpu as pltpu


# ---------------------------------------------------------------------------
# Kernels
# ---------------------------------------------------------------------------

def _conv_block_kernel(cols_ref, w_ref, b_ref, o_ref):
    """Fused conv (as matmul) + bias + ReLU + 2x2 max-pool for ONE image.

    cols_ref: [1, 4, R, K] bf16   (4 pool sub-positions x R pooled positions x K)
    w_ref:    [K, C]       bf16
    b_ref:    [1, C]       f32
    o_ref:    [1, R, C]    bf16
    """
    w = w_ref[...]
    b = b_ref[...]

    def branch(p):
        y = jnp.dot(cols_ref[0, p, :, :], w, preferred_element_type=jnp.float32)
        return y + b

    # max over the 2x2 pool window; relu(max(.)) == max(relu(.)) (monotone).
    y = jnp.maximum(jnp.maximum(branch(0), branch(1)),
                    jnp.maximum(branch(2), branch(3)))
    y = jnp.maximum(y, 0.0)
    o_ref[0, :, :] = y.astype(o_ref.dtype)


def _fc_head_kernel(x_ref, w1_ref, b1_ref, w2_ref, b2_ref, w3_ref, b3_ref, o_ref):
    """softmax(relu(relu(x@W1+b1)@W2+b2)@W3+b3).  Intermediates stay in VMEM."""
    h = jnp.dot(x_ref[...], w1_ref[...], preferred_element_type=jnp.float32)
    h = jnp.maximum(h + b1_ref[...], 0.0)
    h = jnp.dot(h.astype(w2_ref.dtype), w2_ref[...],
                preferred_element_type=jnp.float32)
    h = jnp.maximum(h + b2_ref[...], 0.0)
    z = jnp.dot(h.astype(w3_ref.dtype), w3_ref[...],
                preferred_element_type=jnp.float32)
    z = z + b3_ref[...]
    m = jnp.max(z, axis=1, keepdims=True)
    e = jnp.exp(z - m)
    denom = jnp.sum(e, axis=1, keepdims=True)
    o_ref[...] = (e * pl.reciprocal(denom, approx=True)).astype(o_ref.dtype)


# ---------------------------------------------------------------------------
# pallas_call wrappers
# ---------------------------------------------------------------------------

def conv_block(cols, w, b):
    """cols: [N,4,R,K] bf16, w: [K,C] bf16, b: [1,C] f32 -> [N,R,C] bf16."""
    N, _, R, K = cols.shape
    C = w.shape[1]
    return pl.pallas_call(
        _conv_block_kernel,
        out_shape=jax.ShapeDtypeStruct((N, R, C), jnp.bfloat16),
        grid_spec=pltpu.PrefetchScalarGridSpec(
            num_scalar_prefetch=0,
            grid=(N,),
            in_specs=[
                pl.BlockSpec((1, 4, R, K), lambda n: (n, 0, 0, 0)),
                pl.BlockSpec((K, C), lambda n: (0, 0)),
                pl.BlockSpec((1, C), lambda n: (0, 0)),
            ],
            out_specs=pl.BlockSpec((1, R, C), lambda n: (n, 0, 0)),
        ),
        compiler_params=pltpu.CompilerParams(dimension_semantics=("parallel",)),
    )(cols, w, b)


def fc_head(x, w1, b1, w2, b2, w3, b3, *, block_rows=256):
    """x: [N,F] bf16; weights bf16, biases f32 -> softmax probs [N,10] f32."""
    N, F = x.shape
    bn = min(N, block_rows)
    grid = (pl.cdiv(N, bn),)
    return pl.pallas_call(
        _fc_head_kernel,
        out_shape=jax.ShapeDtypeStruct((N, w3.shape[1]), jnp.float32),
        grid_spec=pltpu.PrefetchScalarGridSpec(
            num_scalar_prefetch=0,
            grid=grid,
            in_specs=[
                pl.BlockSpec((bn, F), lambda i: (i, 0)),
                pl.BlockSpec(w1.shape, lambda i: (0, 0)),
                pl.BlockSpec(b1.shape, lambda i: (0, 0)),
                pl.BlockSpec(w2.shape, lambda i: (0, 0)),
                pl.BlockSpec(b2.shape, lambda i: (0, 0)),
                pl.BlockSpec(w3.shape, lambda i: (0, 0)),
                pl.BlockSpec(b3.shape, lambda i: (0, 0)),
            ],
            out_specs=pl.BlockSpec((bn, w3.shape[1]), lambda i: (i, 0)),
        ),
        compiler_params=pltpu.CompilerParams(dimension_semantics=("parallel",)),
    )(x, w1, b1, w2, b2, w3, b3)


# ---------------------------------------------------------------------------
# Glue: pool-split im2col (tiny static slices, fused by XLA) + forward pass
# ---------------------------------------------------------------------------

def _conv1_cols(x_nchw):
    """x: [N,1,28,28] -> [N, 4, 196, 9] bf16 (pool-sub, (ho,wo), tap)."""
    N = x_nchw.shape[0]
    img = x_nchw[:, 0, :, :].astype(jnp.float32)              # [N,28,28]
    xp = jnp.pad(img, ((0, 0), (1, 1), (1, 1)))               # [N,30,30]
    subs = []
    for ph in range(2):
        for pw in range(2):
            taps = []
            for i in range(3):
                for j in range(3):
                    sl = xp[:, ph + i::2, pw + j::2][:, :14, :14]   # [N,14,14]
                    taps.append(sl)
            subs.append(jnp.stack(taps, axis=-1))               # [N,14,14,9]
    cols = jnp.stack(subs, axis=1)                              # [N,4,14,14,9]
    return cols.reshape(N, 4, 196, 9).astype(jnp.bfloat16)


def _conv2_cols(y1):
    """y1: [N,14,14,32] bf16 (NHWC) -> [N, 4, 25, 800] bf16 (cols = (tap, cin))."""
    N = y1.shape[0]
    subs = []
    for ph in range(2):
        for pw in range(2):
            taps = []
            for i in range(5):
                for j in range(5):
                    sl = y1[:, ph + i::2, pw + j::2, :][:, :5, :5, :]  # [N,5,5,32]
                    taps.append(sl)
            t = jnp.stack(taps, axis=3)                         # [N,5,5,25,32]
            subs.append(t.reshape(N, 25, 25 * 32))              # [N,25,800]
    return jnp.stack(subs, axis=1)                              # [N,4,25,800]


@jax.jit
def cnn_forward(x_nchw, packed):
    (w1p, b1p, w2p, b2p, wf1p, bf1p, wf2p, bf2p, wf3p, bf3p) = packed
    N = x_nchw.shape[0]

    # layer1: Conv2d(1,32,3,pad=1) + ReLU + MaxPool(2,2)  (one fused kernel)
    cols1 = _conv1_cols(x_nchw)                                 # [N,4,196,9]
    y1 = conv_block(cols1, w1p, b1p)                            # [N,196,32] bf16
    y1 = y1.reshape(N, 14, 14, 32)                              # NHWC

    # layer2: Conv2d(32,64,5) + ReLU + MaxPool(2,2)        (one fused kernel)
    cols2 = _conv2_cols(y1)                                     # [N,4,25,800]
    y2 = conv_block(cols2, w2p, b2p)                            # [N,25,64] bf16

    # FC head (fc1+ReLU, fc2+ReLU, fc3+softmax)            (one fused kernel)
    # flatten is (h,w,c)-ordered; wf1p's columns were permuted offline to match.
    feats = y2.reshape(N, 5 * 5 * 64)                           # [N,1600] bf16
    return fc_head(feats, wf1p, bf1p, wf2p, bf2p, wf3p, bf3p)   # [N,10] f32


# ---------------------------------------------------------------------------
# Parameters: PyTorch-shaped init + one-time packing (no per-forward transposes)
# ---------------------------------------------------------------------------

def init_params(key):
    def uni(k, shape, fan_in):
        bound = 1.0 / jnp.sqrt(fan_in)
        return jax.random.uniform(k, shape, jnp.float32, -bound, bound)

    ks = jax.random.split(key, 10)
    w1 = uni(ks[0], (32, 1, 3, 3), 1 * 3 * 3)          # Conv2d(1,32,3,pad=1)
    b1 = uni(ks[1], (32,), 1 * 3 * 3)
    w2 = uni(ks[2], (64, 32, 5, 5), 32 * 5 * 5)        # Conv2d(32,64,5)
    b2 = uni(ks[3], (64,), 32 * 5 * 5)
    wf1 = uni(ks[4], (120, 64 * 5 * 5), 64 * 5 * 5)    # Linear(1600,120)
    bf1 = uni(ks[5], (120,), 64 * 5 * 5)
    wf2 = uni(ks[6], (84, 120), 120)                   # Linear(120,84)
    bf2 = uni(ks[7], (84,), 120)
    wf3 = uni(ks[8], (10, 84), 84)                     # Linear(84,10)
    bf3 = uni(ks[9], (10,), 84)
    return (w1, b1, w2, b2, wf1, bf1, wf2, bf2, wf3, bf3)


def pack_params(params):
    """One-time weight packing: conv filters -> [(kh,kw,cin), cout] columns,
    fc weights transposed, fc1 input columns permuted from PyTorch's (c,h,w)
    flatten order to our (h,w,c) order.  Matmul weights in bf16, biases f32."""
    w1, b1, w2, b2, wf1, bf1, wf2, bf2, wf3, bf3 = params
    w1p = jnp.transpose(w1, (2, 3, 1, 0)).reshape(9, 32).astype(jnp.bfloat16)
    w2p = jnp.transpose(w2, (2, 3, 1, 0)).reshape(25 * 32, 64).astype(jnp.bfloat16)
    wf1p = jnp.transpose(wf1.reshape(120, 64, 5, 5), (2, 3, 1, 0))
    wf1p = wf1p.reshape(1600, 120).astype(jnp.bfloat16)
    wf2p = wf2.T.astype(jnp.bfloat16)
    wf3p = wf3.T.astype(jnp.bfloat16)
    return (w1p, b1.reshape(1, 32).astype(jnp.float32),
            w2p, b2.reshape(1, 64).astype(jnp.float32),
            wf1p, bf1.reshape(1, 120).astype(jnp.float32),
            wf2p, bf2.reshape(1, 84).astype(jnp.float32),
            wf3p, bf3.reshape(1, 10).astype(jnp.float32))


# ---------------------------------------------------------------------------
# Pure-JAX (f32) reference of the PyTorch module, for a sanity check
# ---------------------------------------------------------------------------

def reference_forward(x, params):
    w1, b1, w2, b2, wf1, bf1, wf2, bf2, wf3, bf3 = params
    dn = ("NCHW", "OIHW", "NCHW")
    y = jax.lax.conv_general_dilated(x.astype(jnp.float32), w1, (1, 1),
                                     ((1, 1), (1, 1)), dimension_numbers=dn)
    y = jax.nn.relu(y + b1.reshape(1, 32, 1, 1))
    y = jax.lax.reduce_window(y, -jnp.inf, jax.lax.max,
                              (1, 1, 2, 2), (1, 1, 2, 2), "VALID")
    y = jax.lax.conv_general_dilated(y, w2, (1, 1), "VALID", dimension_numbers=dn)
    y = jax.nn.relu(y + b2.reshape(1, 64, 1, 1))
    y = jax.lax.reduce_window(y, -jnp.inf, jax.lax.max,
                              (1, 1, 2, 2), (1, 1, 2, 2), "VALID")
    y = y.reshape(y.shape[0], -1)                               # PyTorch (c,h,w) order
    y = jax.nn.relu(y @ wf1.T + bf1)
    y = jax.nn.relu(y @ wf2.T + bf2)
    return jax.nn.softmax(y @ wf3.T + bf3, axis=1)


if __name__ == "__main__":
    key = jax.random.PRNGKey(0)
    k_x, k_p = jax.random.split(key)
    # fc1 expects 64*5*5 features -> 28x28 single-channel input (MNIST-like).
    x = jax.random.normal(k_x, (2, 1, 28, 28), dtype=jnp.float32)
    params = init_params(k_p)
    packed = pack_params(params)          # packed once, outside the forward

    out = cnn_forward(x, packed)
    out = jax.block_until_ready(out)

    assert out.shape == (2, 10), out.shape
    row_sums = jnp.sum(out, axis=1)
    assert bool(jnp.all(jnp.abs(row_sums - 1.0) < 1e-2)), row_sums

    ref = reference_forward(x, params)
    err = float(jnp.max(jnp.abs(out - ref)))
    assert err < 3e-2, f"max |pallas - reference| = {err}"

    print("KERNEL_OK")
</pallas_src>

<mosaic_0001>
module attributes {stable_mosaic.version = 11 : i64} {
  func.func @_conv_block_kernel(%arg0: i32, %arg1: memref<1x4x196x9xbf16, #tpu.memory_space<vmem>>, %arg2: memref<9x32xbf16, #tpu.memory_space<vmem>>, %arg3: memref<1x32xf32, #tpu.memory_space<vmem>>, %arg4: memref<1x196x32xbf16, #tpu.memory_space<vmem>>) attributes {dimension_semantics = [#tpu.dimension_semantics<parallel>], iteration_bounds = array<i64: 2>, scalar_prefetch = 0 : i64, scratch_operands = 0 : i64, tpu.core_type = #tpu.core_type<tc>, window_params = [{transform_indices = @transform_0, window_bounds = array<i64: 1, 4, 196, 9>}, {pipeline_mode = #tpu.pipeline_mode<synchronous>, transform_indices = @transform_1, window_bounds = array<i64: 9, 32>}, {pipeline_mode = #tpu.pipeline_mode<synchronous>, transform_indices = @transform_2, window_bounds = array<i64: 1, 32>}, {transform_indices = @transform_3, window_bounds = array<i64: 1, 196, 32>}]} {
    %c0 = arith.constant 0 : index
    %c0_0 = arith.constant 0 : index
    %0 = vector.load %arg2[%c0, %c0_0] : memref<9x32xbf16, #tpu.memory_space<vmem>>, vector<9x32xbf16>
    %c0_1 = arith.constant 0 : index
    %c0_2 = arith.constant 0 : index
    %1 = vector.load %arg3[%c0_1, %c0_2] : memref<1x32xf32, #tpu.memory_space<vmem>>, vector<1x32xf32>
    %c0_3 = arith.constant 0 : index
    %c0_4 = arith.constant 0 : index
    %c0_5 = arith.constant 0 : index
    %c0_6 = arith.constant 0 : index
    %2 = vector.load %arg1[%c0_3, %c0_4, %c0_5, %c0_6] : memref<1x4x196x9xbf16, #tpu.memory_space<vmem>>, vector<1x1x196x9xbf16>
    %3 = vector.shape_cast %2 : vector<1x1x196x9xbf16> to vector<196x9xbf16>
    %cst = arith.constant dense<0.000000e+00> : vector<196x32xf32>
    %4 = tpu.matmul %3, %0, %cst {dimension_numbers = #tpu.dot_dimension_numbers<[1], [0], [0], [1], [0, 0, 1, 1], [], []>} : vector<196x9xbf16>, vector<9x32xbf16>, vector<196x32xf32> -> vector<196x32xf32>
    %5 = vector.broadcast %1 : vector<1x32xf32> to vector<196x32xf32>
    %6 = arith.addf %4, %5 : vector<196x32xf32>
    %c0_7 = arith.constant 0 : index
    %c1 = arith.constant 1 : index
    %c0_8 = arith.constant 0 : index
    %c0_9 = arith.constant 0 : index
    %7 = vector.load %arg1[%c0_7, %c1, %c0_8, %c0_9] : memref<1x4x196x9xbf16, #tpu.memory_space<vmem>>, vector<1x1x196x9xbf16>
    %8 = vector.shape_cast %7 : vector<1x1x196x9xbf16> to vector<196x9xbf16>
    %cst_10 = arith.constant dense<0.000000e+00> : vector<196x32xf32>
    %9 = tpu.matmul %8, %0, %cst_10 {dimension_numbers = #tpu.dot_dimension_numbers<[1], [0], [0], [1], [0, 0, 1, 1], [], []>} : vector<196x9xbf16>, vector<9x32xbf16>, vector<196x32xf32> -> vector<196x32xf32>
    %10 = vector.broadcast %1 : vector<1x32xf32> to vector<196x32xf32>
    %11 = arith.addf %9, %10 : vector<196x32xf32>
    %12 = arith.maximumf %6, %11 : vector<196x32xf32>
    %c0_11 = arith.constant 0 : index
    %c2 = arith.constant 2 : index
    %c0_12 = arith.constant 0 : index
    %c0_13 = arith.constant 0 : index
    %13 = vector.load %arg1[%c0_11, %c2, %c0_12, %c0_13] : memref<1x4x196x9xbf16, #tpu.memory_space<vmem>>, vector<1x1x196x9xbf16>
    %14 = vector.shape_cast %13 : vector<1x1x196x9xbf16> to vector<196x9xbf16>
    %cst_14 = arith.constant dense<0.000000e+00> : vector<196x32xf32>
    %15 = tpu.matmul %14, %0, %cst_14 {dimension_numbers = #tpu.dot_dimension_numbers<[1], [0], [0], [1], [0, 0, 1, 1], [], []>} : vector<196x9xbf16>, vector<9x32xbf16>, vector<196x32xf32> -> vector<196x32xf32>
    %16 = vector.broadcast %1 : vector<1x32xf32> to vector<196x32xf32>
    %17 = arith.addf %15, %16 : vector<196x32xf32>
    %c0_15 = arith.constant 0 : index
    %c3 = arith.constant 3 : index
    %c0_16 = arith.constant 0 : index
    %c0_17 = arith.constant 0 : index
    %18 = vector.load %arg1[%c0_15, %c3, %c0_16, %c0_17] : memref<1x4x196x9xbf16, #tpu.memory_space<vmem>>, vector<1x1x196x9xbf16>
    %19 = vector.shape_cast %18 : vector<1x1x196x9xbf16> to vector<196x9xbf16>
    %cst_18 = arith.constant dense<0.000000e+00> : vector<196x32xf32>
    %20 = tpu.matmul %19, %0, %cst_18 {dimension_numbers = #tpu.dot_dimension_numbers<[1], [0], [0], [1], [0, 0, 1, 1], [], []>} : vector<196x9xbf16>, vector<9x32xbf16>, vector<196x32xf32> -> vector<196x32xf32>
    %21 = vector.broadcast %1 : vector<1x32xf32> to vector<196x32xf32>
    %22 = arith.addf %20, %21 : vector<196x32xf32>
    %23 = arith.maximumf %17, %22 : vector<196x32xf32>
    %24 = arith.maximumf %12, %23 : vector<196x32xf32>
    %cst_19 = arith.constant 0.000000e+00 : f32
    %25 = vector.broadcast %cst_19 : f32 to vector<196x32xf32>
    %26 = arith.maximumf %24, %25 : vector<196x32xf32>
    %27 = arith.truncf %26 : vector<196x32xf32> to vector<196x32xbf16>
    %c0_20 = arith.constant 0 : index
    %c0_21 = arith.constant 0 : index
    %c0_22 = arith.constant 0 : index
    %28 = vector.load %arg4[%c0_20, %c0_21, %c0_22] : memref<1x196x32xbf16, #tpu.memory_space<vmem>>, vector<1x196x32xbf16>
    %29 = vector.shape_cast %28 : vector<1x196x32xbf16> to vector<196x32xbf16>
    %30 = vector.shape_cast %27 : vector<196x32xbf16> to vector<1x196x32xbf16>
    tpu.vector_store %arg4[%c0_20, %c0_21, %c0_22], %30 {strides = array<i32>} : memref<1x196x32xbf16, #tpu.memory_space<vmem>>, vector<1x196x32xbf16>,
    return
  }
  func.func @transform_0(%arg0: i32) -> (i32, i32, i32, i32) {
    %c0_i32 = arith.constant 0 : i32
    %c0_i32_0 = arith.constant 0 : i32
    %c0_i32_1 = arith.constant 0 : i32
    %c0_i32_2 = arith.constant 0 : i32
    return %arg0, %c0_i32, %c0_i32_0, %c0_i32_1 : i32, i32, i32, i32
  }
  func.func @transform_1(%arg0: i32) -> (i32, i32) {
    %c0_i32 = arith.constant 0 : i32
    %c0_i32_0 = arith.constant 0 : i32
    %c0_i32_1 = arith.constant 0 : i32
    return %c0_i32, %c0_i32_0 : i32, i32
  }
  func.func @transform_2(%arg0: i32) -> (i32, i32) {
    %c0_i32 = arith.constant 0 : i32
    %c0_i32_0 = arith.constant 0 : i32
    %c0_i32_1 = arith.constant 0 : i32
    return %c0_i32, %c0_i32_0 : i32, i32
  }
  func.func @transform_3(%arg0: i32) -> (i32, i32, i32) {
    %c0_i32 = arith.constant 0 : i32
    %c0_i32_0 = arith.constant 0 : i32
    %c0_i32_1 = arith.constant 0 : i32
    return %arg0, %c0_i32, %c0_i32_0 : i32, i32, i32
  }
}

module attributes {stable_mosaic.version = 11 : i64} {
  func.func @_conv_block_kernel(%arg0: i32, %arg1: memref<1x4x25x800xbf16, #tpu.memory_space<vmem>>, %arg2: memref<800x64xbf16, #tpu.memory_space<vmem>>, %arg3: memref<1x64xf32, #tpu.memory_space<vmem>>, %arg4: memref<1x25x64xbf16, #tpu.memory_space<vmem>>) attributes {dimension_semantics = [#tpu.dimension_semantics<parallel>], iteration_bounds = array<i64: 2>, scalar_prefetch = 0 : i64, scratch_operands = 0 : i64, tpu.core_type = #tpu.core_type<tc>, window_params = [{transform_indices = @transform_0, window_bounds = array<i64: 1, 4, 25, 800>}, {pipeline_mode = #tpu.pipeline_mode<synchronous>, transform_indices = @transform_1, window_bounds = array<i64: 800, 64>}, {pipeline_mode = #tpu.pipeline_mode<synchronous>, transform_indices = @transform_2, window_bounds = array<i64: 1, 64>}, {transform_indices = @transform_3, window_bounds = array<i64: 1, 25, 64>}]} {
    %c0 = arith.constant 0 : index
    %c0_0 = arith.constant 0 : index
    %0 = vector.load %arg2[%c0, %c0_0] : memref<800x64xbf16, #tpu.memory_space<vmem>>, vector<800x64xbf16>
    %c0_1 = arith.constant 0 : index
    %c0_2 = arith.constant 0 : index
    %1 = vector.load %arg3[%c0_1, %c0_2] : memref<1x64xf32, #tpu.memory_space<vmem>>, vector<1x64xf32>
    %c0_3 = arith.constant 0 : index
    %c0_4 = arith.constant 0 : index
    %c0_5 = arith.constant 0 : index
    %c0_6 = arith.constant 0 : index
    %2 = vector.load %arg1[%c0_3, %c0_4, %c0_5, %c0_6] : memref<1x4x25x800xbf16, #tpu.memory_space<vmem>>, vector<1x1x25x800xbf16>
    %3 = vector.shape_cast %2 : vector<1x1x25x800xbf16> to vector<25x800xbf16>
    %cst = arith.constant dense<0.000000e+00> : vector<25x64xf32>
    %4 = tpu.matmul %3, %0, %cst {dimension_numbers = #tpu.dot_dimension_numbers<[1], [0], [0], [1], [0, 0, 1, 1], [], []>} : vector<25x800xbf16>, vector<800x64xbf16>, vector<25x64xf32> -> vector<25x64xf32>
    %5 = vector.broadcast %1 : vector<1x64xf32> to vector<25x64xf32>
    %6 = arith.addf %4, %5 : vector<25x64xf32>
    %c0_7 = arith.constant 0 : index
    %c1 = arith.constant 1 : index
    %c0_8 = arith.constant 0 : index
    %c0_9 = arith.constant 0 : index
    %7 = vector.load %arg1[%c0_7, %c1, %c0_8, %c0_9] : memref<1x4x25x800xbf16, #tpu.memory_space<vmem>>, vector<1x1x25x800xbf16>
    %8 = vector.shape_cast %7 : vector<1x1x25x800xbf16> to vector<25x800xbf16>
    %cst_10 = arith.constant dense<0.000000e+00> : vector<25x64xf32>
    %9 = tpu.matmul %8, %0, %cst_10 {dimension_numbers = #tpu.dot_dimension_numbers<[1], [0], [0], [1], [0, 0, 1, 1], [], []>} : vector<25x800xbf16>, vector<800x64xbf16>, vector<25x64xf32> -> vector<25x64xf32>
    %10 = vector.broadcast %1 : vector<1x64xf32> to vector<25x64xf32>
    %11 = arith.addf %9, %10 : vector<25x64xf32>
    %12 = arith.maximumf %6, %11 : vector<25x64xf32>
    %c0_11 = arith.constant 0 : index
    %c2 = arith.constant 2 : index
    %c0_12 = arith.constant 0 : index
    %c0_13 = arith.constant 0 : index
    %13 = vector.load %arg1[%c0_11, %c2, %c0_12, %c0_13] : memref<1x4x25x800xbf16, #tpu.memory_space<vmem>>, vector<1x1x25x800xbf16>
    %14 = vector.shape_cast %13 : vector<1x1x25x800xbf16> to vector<25x800xbf16>
    %cst_14 = arith.constant dense<0.000000e+00> : vector<25x64xf32>
    %15 = tpu.matmul %14, %0, %cst_14 {dimension_numbers = #tpu.dot_dimension_numbers<[1], [0], [0], [1], [0, 0, 1, 1], [], []>} : vector<25x800xbf16>, vector<800x64xbf16>, vector<25x64xf32> -> vector<25x64xf32>
    %16 = vector.broadcast %1 : vector<1x64xf32> to vector<25x64xf32>
    %17 = arith.addf %15, %16 : vector<25x64xf32>
    %c0_15 = arith.constant 0 : index
    %c3 = arith.constant 3 : index
    %c0_16 = arith.constant 0 : index
    %c0_17 = arith.constant 0 : index
    %18 = vector.load %arg1[%c0_15, %c3, %c0_16, %c0_17] : memref<1x4x25x800xbf16, #tpu.memory_space<vmem>>, vector<1x1x25x800xbf16>
    %19 = vector.shape_cast %18 : vector<1x1x25x800xbf16> to vector<25x800xbf16>
    %cst_18 = arith.constant dense<0.000000e+00> : vector<25x64xf32>
    %20 = tpu.matmul %19, %0, %cst_18 {dimension_numbers = #tpu.dot_dimension_numbers<[1], [0], [0], [1], [0, 0, 1, 1], [], []>} : vector<25x800xbf16>, vector<800x64xbf16>, vector<25x64xf32> -> vector<25x64xf32>
    %21 = vector.broadcast %1 : vector<1x64xf32> to vector<25x64xf32>
    %22 = arith.addf %20, %21 : vector<25x64xf32>
    %23 = arith.maximumf %17, %22 : vector<25x64xf32>
    %24 = arith.maximumf %12, %23 : vector<25x64xf32>
    %cst_19 = arith.constant 0.000000e+00 : f32
    %25 = vector.broadcast %cst_19 : f32 to vector<25x64xf32>
    %26 = arith.maximumf %24, %25 : vector<25x64xf32>
    %27 = arith.truncf %26 : vector<25x64xf32> to vector<25x64xbf16>
    %c0_20 = arith.constant 0 : index
    %c0_21 = arith.constant 0 : index
    %c0_22 = arith.constant 0 : index
    %28 = vector.load %arg4[%c0_20, %c0_21, %c0_22] : memref<1x25x64xbf16, #tpu.memory_space<vmem>>, vector<1x25x64xbf16>
    %29 = vector.shape_cast %28 : vector<1x25x64xbf16> to vector<25x64xbf16>
    %30 = vector.shape_cast %27 : vector<25x64xbf16> to vector<1x25x64xbf16>
    tpu.vector_store %arg4[%c0_20, %c0_21, %c0_22], %30 {strides = array<i32>} : memref<1x25x64xbf16, #tpu.memory_space<vmem>>, vector<1x25x64xbf16>,
    return
  }
  func.func @transform_0(%arg0: i32) -> (i32, i32, i32, i32) {
    %c0_i32 = arith.constant 0 : i32
    %c0_i32_0 = arith.constant 0 : i32
    %c0_i32_1 = arith.constant 0 : i32
    %c0_i32_2 = arith.constant 0 : i32
    return %arg0, %c0_i32, %c0_i32_0, %c0_i32_1 : i32, i32, i32, i32
  }
  func.func @transform_1(%arg0: i32) -> (i32, i32) {
    %c0_i32 = arith.constant 0 : i32
    %c0_i32_0 = arith.constant 0 : i32
    %c0_i32_1 = arith.constant 0 : i32
    return %c0_i32, %c0_i32_0 : i32, i32
  }
  func.func @transform_2(%arg0: i32) -> (i32, i32) {
    %c0_i32 = arith.constant 0 : i32
    %c0_i32_0 = arith.constant 0 : i32
    %c0_i32_1 = arith.constant 0 : i32
    return %c0_i32, %c0_i32_0 : i32, i32
  }
  func.func @transform_3(%arg0: i32) -> (i32, i32, i32) {
    %c0_i32 = arith.constant 0 : i32
    %c0_i32_0 = arith.constant 0 : i32
    %c0_i32_1 = arith.constant 0 : i32
    return %arg0, %c0_i32, %c0_i32_0 : i32, i32, i32
  }
}

module attributes {stable_mosaic.version = 11 : i64} {
  func.func @_fc_head_kernel(%arg0: i32, %arg1: memref<2x1600xbf16, #tpu.memory_space<vmem>>, %arg2: memref<1600x120xbf16, #tpu.memory_space<vmem>>, %arg3: memref<1x120xf32, #tpu.memory_space<vmem>>, %arg4: memref<120x84xbf16, #tpu.memory_space<vmem>>, %arg5: memref<1x84xf32, #tpu.memory_space<vmem>>, %arg6: memref<84x10xbf16, #tpu.memory_space<vmem>>, %arg7: memref<1x10xf32, #tpu.memory_space<vmem>>, %arg8: memref<2x10xf32, #tpu.memory_space<vmem>>) attributes {dimension_semantics = [#tpu.dimension_semantics<parallel>], iteration_bounds = array<i64: 1>, scalar_prefetch = 0 : i64, scratch_operands = 0 : i64, tpu.core_type = #tpu.core_type<tc>, window_params = [{transform_indices = @transform_0, window_bounds = array<i64: 2, 1600>}, {pipeline_mode = #tpu.pipeline_mode<synchronous>, transform_indices = @transform_1, window_bounds = array<i64: 1600, 120>}, {pipeline_mode = #tpu.pipeline_mode<synchronous>, transform_indices = @transform_2, window_bounds = array<i64: 1, 120>}, {pipeline_mode = #tpu.pipeline_mode<synchronous>, transform_indices = @transform_3, window_bounds = array<i64: 120, 84>}, {pipeline_mode = #tpu.pipeline_mode<synchronous>, transform_indices = @transform_4, window_bounds = array<i64: 1, 84>}, {pipeline_mode = #tpu.pipeline_mode<synchronous>, transform_indices = @transform_5, window_bounds = array<i64: 84, 10>}, {pipeline_mode = #tpu.pipeline_mode<synchronous>, transform_indices = @transform_6, window_bounds = array<i64: 1, 10>}, {transform_indices = @transform_7, window_bounds = array<i64: 2, 10>}]} {
    %c0 = arith.constant 0 : index
    %c0_0 = arith.constant 0 : index
    %0 = vector.load %arg1[%c0, %c0_0] : memref<2x1600xbf16, #tpu.memory_space<vmem>>, vector<2x1600xbf16>
    %c0_1 = arith.constant 0 : index
    %c0_2 = arith.constant 0 : index
    %1 = vector.load %arg2[%c0_1, %c0_2] : memref<1600x120xbf16, #tpu.memory_space<vmem>>, vector<1600x120xbf16>
    %cst = arith.constant dense<0.000000e+00> : vector<2x120xf32>
    %2 = tpu.matmul %0, %1, %cst {dimension_numbers = #tpu.dot_dimension_numbers<[1], [0], [0], [1], [0, 0, 1, 1], [], []>} : vector<2x1600xbf16>, vector<1600x120xbf16>, vector<2x120xf32> -> vector<2x120xf32>
    %c0_3 = arith.constant 0 : index
    %c0_4 = arith.constant 0 : index
    %3 = vector.load %arg3[%c0_3, %c0_4] : memref<1x120xf32, #tpu.memory_space<vmem>>, vector<1x120xf32>
    %4 = vector.broadcast %3 : vector<1x120xf32> to vector<2x120xf32>
    %5 = arith.addf %2, %4 : vector<2x120xf32>
    %cst_5 = arith.constant 0.000000e+00 : f32
    %6 = vector.broadcast %cst_5 : f32 to vector<2x120xf32>
    %7 = arith.maximumf %5, %6 : vector<2x120xf32>
    %8 = arith.truncf %7 : vector<2x120xf32> to vector<2x120xbf16>
    %c0_6 = arith.constant 0 : index
    %c0_7 = arith.constant 0 : index
    %9 = vector.load %arg4[%c0_6, %c0_7] : memref<120x84xbf16, #tpu.memory_space<vmem>>, vector<120x84xbf16>
    %cst_8 = arith.constant dense<0.000000e+00> : vector<2x84xf32>
    %10 = tpu.matmul %8, %9, %cst_8 {dimension_numbers = #tpu.dot_dimension_numbers<[1], [0], [0], [1], [0, 0, 1, 1], [], []>} : vector<2x120xbf16>, vector<120x84xbf16>, vector<2x84xf32> -> vector<2x84xf32>
    %c0_9 = arith.constant 0 : index
    %c0_10 = arith.constant 0 : index
    %11 = vector.load %arg5[%c0_9, %c0_10] : memref<1x84xf32, #tpu.memory_space<vmem>>, vector<1x84xf32>
    %12 = vector.broadcast %11 : vector<1x84xf32> to vector<2x84xf32>
    %13 = arith.addf %10, %12 : vector<2x84xf32>
    %cst_11 = arith.constant 0.000000e+00 : f32
    %14 = vector.broadcast %cst_11 : f32 to vector<2x84xf32>
    %15 = arith.maximumf %13, %14 : vector<2x84xf32>
    %16 = arith.truncf %15 : vector<2x84xf32> to vector<2x84xbf16>
    %c0_12 = arith.constant 0 : index
    %c0_13 = arith.constant 0 : index
    %17 = vector.load %arg6[%c0_12, %c0_13] : memref<84x10xbf16, #tpu.memory_space<vmem>>, vector<84x10xbf16>
    %cst_14 = arith.constant dense<0.000000e+00> : vector<2x10xf32>
    %18 = tpu.matmul %16, %17, %cst_14 {dimension_numbers = #tpu.dot_dimension_numbers<[1], [0], [0], [1], [0, 0, 1, 1], [], []>} : vector<2x84xbf16>, vector<84x10xbf16>, vector<2x10xf32> -> vector<2x10xf32>
    %c0_15 = arith.constant 0 : index
    %c0_16 = arith.constant 0 : index
    %19 = vector.load %arg7[%c0_15, %c0_16] : memref<1x10xf32, #tpu.memory_space<vmem>>, vector<1x10xf32>
    %20 = vector.broadcast %19 : vector<1x10xf32> to vector<2x10xf32>
    %21 = arith.addf %18, %20 : vector<2x10xf32>
    %cst_17 = arith.constant dense<0xFF800000> : vector<2xf32>
    %22 = vector.multi_reduction <maximumf>, %21, %cst_17 [1] : vector<2x10xf32> to vector<2xf32>
    %23 = vector.shape_cast %22 : vector<2xf32> to vector<2x1xf32>
    %24 = vector.broadcast %23 : vector<2x1xf32> to vector<2x10xf32>
    %25 = arith.subf %21, %24 : vector<2x10xf32>
    %26 = math.exp %25 : vector<2x10xf32>
    %cst_18 = arith.constant dense<0.000000e+00> : vector<2xf32>
    %27 = vector.multi_reduction <add>, %26, %cst_18 [1] : vector<2x10xf32> to vector<2xf32>
    %28 = vector.shape_cast %27 : vector<2xf32> to vector<2x1xf32>
    %29 = tpu.reciprocal %28 {approx = true} : vector<2x1xf32> -> vector<2x1xf32>
    %30 = vector.broadcast %29 : vector<2x1xf32> to vector<2x10xf32>
    %31 = arith.mulf %26, %30 : vector<2x10xf32>
    %c0_19 = arith.constant 0 : index
    %c0_20 = arith.constant 0 : index
    %32 = vector.load %arg8[%c0_19, %c0_20] : memref<2x10xf32, #tpu.memory_space<vmem>>, vector<2x10xf32>
    tpu.vector_store %arg8[%c0_19, %c0_20], %31 {strides = array<i32>} : memref<2x10xf32, #tpu.memory_space<vmem>>, vector<2x10xf32>,
    return
  }
  func.func @transform_0(%arg0: i32) -> (i32, i32) {
    %c0_i32 = arith.constant 0 : i32
    %c0_i32_0 = arith.constant 0 : i32
    return %arg0, %c0_i32 : i32, i32
  }
  func.func @transform_1(%arg0: i32) -> (i32, i32) {
    %c0_i32 = arith.constant 0 : i32
    %c0_i32_0 = arith.constant 0 : i32
    %c0_i32_1 = arith.constant 0 : i32
    return %c0_i32, %c0_i32_0 : i32, i32
  }
  func.func @transform_2(%arg0: i32) -> (i32, i32) {
    %c0_i32 = arith.constant 0 : i32
    %c0_i32_0 = arith.constant 0 : i32
    %c0_i32_1 = arith.constant 0 : i32
    return %c0_i32, %c0_i32_0 : i32, i32
  }
  func.func @transform_3(%arg0: i32) -> (i32, i32) {
    %c0_i32 = arith.constant 0 : i32
    %c0_i32_0 = arith.constant 0 : i32
    %c0_i32_1 = arith.constant 0 : i32
    return %c0_i32, %c0_i32_0 : i32, i32
  }
  func.func @transform_4(%arg0: i32) -> (i32, i32) {
    %c0_i32 = arith.constant 0 : i32
    %c0_i32_0 = arith.constant 0 : i32
    %c0_i32_1 = arith.constant 0 : i32
    return %c0_i32, %c0_i32_0 : i32, i32
  }
  func.func @transform_5(%arg0: i32) -> (i32, i32) {
    %c0_i32 = arith.constant 0 : i32
    %c0_i32_0 = arith.constant 0 : i32
    %c0_i32_1 = arith.constant 0 : i32
    return %c0_i32, %c0_i32_0 : i32, i32
  }
  func.func @transform_6(%arg0: i32) -> (i32, i32) {
    %c0_i32 = arith.constant 0 : i32
    %c0_i32_0 = arith.constant 0 : i32
    %c0_i32_1 = arith.constant 0 : i32
    return %c0_i32, %c0_i32_0 : i32, i32
  }
  func.func @transform_7(%arg0: i32) -> (i32, i32) {
    %c0_i32 = arith.constant 0 : i32
    %c0_i32_0 = arith.constant 0 : i32
    return %arg0, %c0_i32 : i32, i32
  }
}

</mosaic_0001>

<bundles_post_ra>
// kernel: cnn_forward.3
= control target key start
LH: loop header
LB: loop body
LE: loop exit
PB: predicated region body
PF: predicated region fallthrough
CT: control target
= control target key end

     0   :  { %s1623_s12 = smov 0   ;;  %s1912_s0 = inlined_call_operand.vmem [shape: bf16[2,4,196,9], index: 0, kind: input, shape index: {}]   ;;  %s1913_s1 = inlined_call_operand.vmem [shape: bf16[9,32], index: 1, kind: input, shape index: {}]   ;;  %s1914_s2 = inlined_call_operand.vmem [shape: f32[1,32], index: 2, kind: input, shape index: {}]   ;;  %s1915_s3 = inlined_call_operand.vmem [shape: bf16[2,196,32], index: 3, kind: output, shape index: {}]  }
   0x1 LB: > { %s1201_s13 = sadd.s32 4294967295, %s1600_s12   ;;  %p1205_p0 = scmp.ge.s32.totalorder %s1600_s12, 1  ;;  %s1600_s12 = sphi %s1623_s12, %s13_s12  }
   0x2   : > { %p137_p1 = scmp.lt.s32.totalorder %s1600_s12, 3 }
   0x4   : > { %p138_p2 = pnand %p1205_p0, %p137_p1 }
   0x5   : > { %p161_p3 = scmp.lt.s32.totalorder (!%p138_p2), %s1201_s13, 1 }
   0x6   : > { %141 = sbr.rel (%p138_p2) target bundleno = 356 (0x164), region = 32 }
   0xb   : > { %v1258_v0 = vld [vmem:[%s1913_s1] sm:$0xf]  ;;  %v1533_v1 = vld [vmem:[%s1913_s1] sm:$0x10]  ;;  %vm311_vm0 = vcmask 1043456   ;;  %vm312_vm1 = vcmask 1044480  }
   0xc   : > { %v1259_v2 = vor.u32 %v1533_v1, %v1258_v0  ;;  %v1602_v3 = vmov 65535   ;;  %s1917_s13 = smov (!%p161_p3, %s1201_s13), 1  ;;  %vm271_vm2 = vcmask 72704   ;;  %v1714_v41 = vld [vmem:[%s1914_s2] ss:$0 sm:$0xff]  ;;  %vm1119_vm3 = vcmask 257024  }
   0xd   : > { %v313_v4 = vsel %vm311_vm0, 4294967295, %v1602_v3  ;;  %s1582_s18 = smul.u32 400, %s1917_s13  ;;  %vm1144_vm4 = vcmask 254976  }
   0xe   : > { %v314_v5 = vsel %vm312_vm1, %v313_v4, 0  ;;  %s1583_s24 = smul.u32 100, %s1917_s13 }
   0xf   : > { %v316_v6 = vand.u32 %v1259_v2, %v314_v5  ;;  %s1643_s21 = scalar_lea.vmem %s1912_s0, %s1582_s18 }
  0x10   : > { %v1534_v7 = vld [vmem:[%s1643_s21] sm:$0xff]  ;;  %v1558_v9 = vld [vmem:[%s1643_s21 + $0xc8] sm:$0xff]  ;;  %v1559_v13 = vld [vmem:[%s1643_s21 + $0xd0] sm:$0xff]  ;;  %s1732_s27 = scalar_lea.vmem %s1915_s3, %s1583_s24 }
  0x11   : > { %325 = vmatpush.bf16.msra.mxu0 %v316_v6  ;;  %526 = vmatpush.bf16.msra.mxu1 %v316_v6  ;;  %v1546_v8 = vld [vmem:[%s1643_s21 + $0x64] sm:$0xff]  ;;  %v1570_v10 = vld [vmem:[%s1643_s21 + $0x12c] sm:$0xff]  ;;  %v1571_v14 = vld [vmem:[%s1643_s21 + $0x134] sm:$0xff] }
  0x12   : > { %752 = vmatpush.bf16.msra.mxu2 %v316_v6  ;;  %953 = vmatpush.bf16.msra.mxu3 %v316_v6  ;;  %v1535_v11 = vld [vmem:[%s1643_s21 + $0x8] sm:$0xff]  ;;  %v1536_v15 = vld [vmem:[%s1643_s21 + $0x10] sm:$0xff]  ;;  %v1560_v17 = vld [vmem:[%s1643_s21 + $0xd8] sm:$0xff] }
  0x13   : > { %v1547_v12 = vld [vmem:[%s1643_s21 + $0x6c] sm:$0xff]  ;;  %v1548_v16 = vld [vmem:[%s1643_s21 + $0x74] sm:$0xff]  ;;  %v1572_v18 = vld [vmem:[%s1643_s21 + $0x13c] sm:$0xff] }
  0x14   : > { %1260 = vmatmul.msk.bf16.vlgmr.msra.gmra.mxu0 %vm271_vm2, %v1534_v7  ;;  %1346 = vmatmul.msk.bf16.vlgmr.msra.gmra.mxu1 %vm271_vm2, %v1546_v8  ;;  %v1537_v19 = vld [vmem:[%s1643_s21 + $0x18] sm:$0xff]  ;;  %v1561_v21 = vld [vmem:[%s1643_s21 + $0xe0] sm:$0xff]  ;;  %v1562_v25 = vld [vmem:[%s1643_s21 + $0xe8] sm:$0xff] }
  0x15   : > { %1432 = vmatmul.msk.bf16.vlgmr.msra.gmra.mxu2 %vm271_vm2, %v1558_v9  ;;  %1518 = vmatmul.msk.bf16.vlgmr.msra.gmra.mxu3 %vm271_vm2, %v1570_v10  ;;  %v1549_v20 = vld [vmem:[%s1643_s21 + $0x7c] sm:$0xff]  ;;  %v1573_v22 = vld [vmem:[%s1643_s21 + $0x144] sm:$0xff]  ;;  %v1574_v26 = vld [vmem:[%s1643_s21 + $0x14c] sm:$0xff] }
  0x16   : > { %v1538_v23 = vld [vmem:[%s1643_s21 + $0x20] sm:$0xff]  ;;  %v1539_v27 = vld [vmem:[%s1643_s21 + $0x28] sm:$0xff]  ;;  %v1563_v29 = vld [vmem:[%s1643_s21 + $0xf0] sm:$0xff] }
  0x17   : > { %v1550_v24 = vld [vmem:[%s1643_s21 + $0x84] sm:$0xff]  ;;  %v1551_v28 = vld [vmem:[%s1643_s21 + $0x8c] sm:$0xff]  ;;  %v1575_v30 = vld [vmem:[%s1643_s21 + $0x154] sm:$0xff] }
  0x18   : > { %v1540_v31 = vld [vmem:[%s1643_s21 + $0x30] sm:$0xff]  ;;  %v1564_v33 = vld [vmem:[%s1643_s21 + $0xf8] sm:$0xff]  ;;  %v1565_v37 = vld [vmem:[%s1643_s21 + $0x100] sm:$0xff] }
  0x19   : > { %v1552_v32 = vld [vmem:[%s1643_s21 + $0x94] sm:$0xff]  ;;  %v1576_v34 = vld [vmem:[%s1643_s21 + $0x15c] sm:$0xff]  ;;  %v1577_v38 = vld [vmem:[%s1643_s21 + $0x164] sm:$0xff] }
  0x1a   : > { %v1541_v35 = vld [vmem:[%s1643_s21 + $0x38] sm:$0xff]  ;;  %v1542_v39 = vld [vmem:[%s1643_s21 + $0x40] sm:$0xff]  ;;  %v1566_v44 = vld [vmem:[%s1643_s21 + $0x108] sm:$0xff] }
  0x1b   : > { %v1553_v36 = vld [vmem:[%s1643_s21 + $0x9c] sm:$0xff]  ;;  %v1554_v40 = vld [vmem:[%s1643_s21 + $0xa4] sm:$0xff]  ;;  %v1578_v45 = vld [vmem:[%s1643_s21 + $0x16c] sm:$0xff] }
  0x1c   : > { %v1543_v62 = vld [vmem:[%s1643_s21 + $0x48] sm:$0xff]  ;;  %v1567_v5 = vld [vmem:[%s1643_s21 + $0x110] sm:$0xff] }
  0x1d   : > { %v1555_v63 = vld [vmem:[%s1643_s21 + $0xac] sm:$0xff]  ;;  %v1579_v6 = vld [vmem:[%s1643_s21 + $0x174] sm:$0xff] }
  0x24   : > { %1261 = vmatmul.msk.bf16.gmra.mxu0 %vm271_vm2, %v1535_v11  ;;  %1347 = vmatmul.msk.bf16.gmra.mxu1 %vm271_vm2, %v1547_v12 }
  0x25   : > { %1433 = vmatmul.msk.bf16.gmra.mxu2 %vm271_vm2, %v1559_v13  ;;  %1519 = vmatmul.msk.bf16.gmra.mxu3 %vm271_vm2, %v1571_v14 }
  0x34   : > { %1262 = vmatmul.msk.bf16.gmra.mxu0 %vm271_vm2, %v1536_v15  ;;  %1348 = vmatmul.msk.bf16.gmra.mxu1 %vm271_vm2, %v1548_v16 }
  0x35   : > { %1434 = vmatmul.msk.bf16.gmra.mxu2 %vm271_vm2, %v1560_v17  ;;  %1520 = vmatmul.msk.bf16.gmra.mxu3 %vm271_vm2, %v1572_v18 }
  0x44   : > { %1263 = vmatmul.msk.bf16.gmra.mxu0 %vm271_vm2, %v1537_v19  ;;  %1349 = vmatmul.msk.bf16.gmra.mxu1 %vm271_vm2, %v1549_v20 }
  0x45   : > { %1435 = vmatmul.msk.bf16.gmra.mxu2 %vm271_vm2, %v1561_v21  ;;  %1521 = vmatmul.msk.bf16.gmra.mxu3 %vm271_vm2, %v1573_v22 }
  0x54   : > { %1264 = vmatmul.msk.bf16.gmra.mxu0 %vm271_vm2, %v1538_v23  ;;  %1350 = vmatmul.msk.bf16.gmra.mxu1 %vm271_vm2, %v1550_v24 }
  0x55   : > { %1436 = vmatmul.msk.bf16.gmra.mxu2 %vm271_vm2, %v1562_v25  ;;  %1522 = vmatmul.msk.bf16.gmra.mxu3 %vm271_vm2, %v1574_v26 }
  0x64   : > { %1265 = vmatmul.msk.bf16.gmra.mxu0 %vm271_vm2, %v1539_v27  ;;  %1351 = vmatmul.msk.bf16.gmra.mxu1 %vm271_vm2, %v1551_v28  ;;  %v1544_v28 = vld [vmem:[%s1643_s21 + $0x50] sm:$0xff] }
  0x65   : > { %1437 = vmatmul.msk.bf16.gmra.mxu2 %vm271_vm2, %v1563_v29  ;;  %1523 = vmatmul.msk.bf16.gmra.mxu3 %vm271_vm2, %v1575_v30  ;;  %v1556_v29 = vld [vmem:[%s1643_s21 + $0xb4] sm:$0xff] }
  0x74   : > { %1266 = vmatmul.msk.bf16.gmra.mxu0 %vm271_vm2, %v1540_v31  ;;  %1352 = vmatmul.msk.bf16.gmra.mxu1 %vm271_vm2, %v1552_v32 }
  0x75   : > { %1438 = vmatmul.msk.bf16.gmra.mxu2 %vm271_vm2, %v1564_v33  ;;  %1524 = vmatmul.msk.bf16.gmra.mxu3 %vm271_vm2, %v1576_v34 }
  0x84   : > { %1267 = vmatmul.msk.bf16.gmra.mxu0 %vm271_vm2, %v1541_v35  ;;  %1353 = vmatmul.msk.bf16.gmra.mxu1 %vm271_vm2, %v1553_v36  ;;  %v1568_v35 = vld [vmem:[%s1643_s21 + $0x118] sm:$0xff] }
  0x85   : > { %1439 = vmatmul.msk.bf16.gmra.mxu2 %vm271_vm2, %v1565_v37  ;;  %1525 = vmatmul.msk.bf16.gmra.mxu3 %vm271_vm2, %v1577_v38  ;;  %v1580_v36 = vld [vmem:[%s1643_s21 + $0x17c] sm:$0xff] }
  0x91   : > { %v327_v42 = vpop.f32.mrf.mxu0  ;;  %v528_v43 = vpop.f32.mrf.mxu1 }
  0x92   : > { %v328_v46 = vadd.f32 %v1714_v41, %v327_v42  ;;  %v529_v47 = vadd.f32 %v1714_v41, %v528_v43 }
  0x94   : > { %1268 = vmatmul.msk.bf16.gmra.mxu0 %vm271_vm2, %v1542_v39  ;;  %1354 = vmatmul.msk.bf16.gmra.mxu1 %vm271_vm2, %v1554_v40  ;;  %v592_v50 = vmax.f32 %v328_v46, %v529_v47 }
  0x95   : > { %1440 = vmatmul.msk.bf16.gmra.mxu2 %vm271_vm2, %v1566_v44  ;;  %1526 = vmatmul.msk.bf16.gmra.mxu3 %vm271_vm2, %v1578_v45 }
  0x98   : > { %v754_v48 = vpop.f32.mrf.mxu2  ;;  %v955_v49 = vpop.f32.mrf.mxu3 }
  0x99   : > { %v755_v51 = vadd.f32 %v1714_v41, %v754_v48  ;;  %v956_v52 = vadd.f32 %v1714_v41, %v955_v49  ;;  %v329_v53 = vpop.f32.mrf.mxu0  ;;  %v530_v54 = vpop.f32.mrf.mxu1 }
  0x9a   : > { %v330_v58 = vadd.f32 %v1714_v41, %v329_v53  ;;  %v531_v59 = vadd.f32 %v1714_v41, %v530_v54 }
  0x9b   : > { %v1019_v55 = vmax.f32 %v755_v51, %v956_v52 }
  0x9c   : > { %v593_v7 = vmax.f32 %v330_v58, %v531_v59  ;;  %v1545_v59 = vld [vmem:[%s1643_s21 + $0x58] sm:$0xff] }
  0x9d   : > { %v1044_v56 = vmax.f32 %v592_v50, %v1019_v55 }
  0x9f   : > { %v1069_v57 = vmax.f32 %v1044_v56, 0.0 }
  0xa0   : > { %v756_v60 = vpop.f32.mrf.mxu2  ;;  %v957_v61 = vpop.f32.mrf.mxu3 }
  0xa1   : > { %v1094_v0 = vpack.c.bf16 %v1069_v57, %v1069_v57  ;;  %v757_v1 = vadd.f32 %v1714_v41, %v756_v60  ;;  %v958_v2 = vadd.f32 %v1714_v41, %v957_v61  ;;  %v332_v3 = vpop.f32.mrf.mxu0  ;;  %v533_v4 = vpop.f32.mrf.mxu1  ;;  %v1557_v60 = vld [vmem:[%s1643_s21 + $0xbc] sm:$0xff] }
  0xa2   : > { %v333_v10 = vadd.f32 %v1714_v41, %v332_v3  ;;  %v534_v11 = vadd.f32 %v1714_v41, %v533_v4  ;;  %v1581_v3 = vld [vmem:[%s1643_s21 + $0x184] sm:$0xff] }
  0xa3   : > { %1120 = vst.msk [vmem:[%s1732_s27] sm:$0xf] %vm1119_vm3, %v1094_v0  ;;  %v1020_v8 = vmax.f32 %v757_v1, %v958_v2  ;;  %v1569_v2 = vld [vmem:[%s1643_s21 + $0x120] sm:$0xff] }
  0xa4   : > { %1269 = vmatmul.msk.bf16.gmra.mxu0 %vm271_vm2, %v1543_v62  ;;  %1355 = vmatmul.msk.bf16.gmra.mxu1 %vm271_vm2, %v1555_v63  ;;  %v594_v16 = vmax.f32 %v333_v10, %v534_v11 }
  0xa5   : > { %v1045_v9 = vmax.f32 %v593_v7, %v1020_v8  ;;  %1441 = vmatmul.msk.bf16.gmra.mxu2 %vm271_vm2, %v1567_v5  ;;  %1527 = vmatmul.msk.bf16.gmra.mxu3 %vm271_vm2, %v1579_v6 }
  0xa7   : > { %v1070_v12 = vmax.f32 %v1045_v9, 0.0 }
  0xa8   : > { %v759_v13 = vpop.f32.mrf.mxu2  ;;  %v960_v14 = vpop.f32.mrf.mxu3 }
  0xa9   : > { %v1095_v15 = vpack.c.bf16 %v1070_v12, %v1070_v12  ;;  %v760_v17 = vadd.f32 %v1714_v41, %v759_v13  ;;  %v961_v18 = vadd.f32 %v1714_v41, %v960_v14  ;;  %v334_v19 = vpop.f32.mrf.mxu0  ;;  %v535_v20 = vpop.f32.mrf.mxu1 }
  0xaa   : > { %v335_v24 = vadd.f32 %v1714_v41, %v334_v19  ;;  %v536_v25 = vadd.f32 %v1714_v41, %v535_v20  ;;  %v1297_v19 = vld [vmem:[%s1643_s21 + $0xc4] sm:$0x3]  ;;  %v1383_v20 = vld [vmem:[%s1643_s21 + $0x128] sm:$0x3] }
  0xab   : > { %1121 = vst.msk [vmem:[%s1732_s27 + $0x4] sm:$0xf] %vm1119_vm3, %v1095_v15  ;;  %v1021_v21 = vmax.f32 %v760_v17, %v961_v18  ;;  %v199_v18 = vld [vmem:[%s1643_s21 + $0x60] sm:$0x3] }
  0xac   : > { %v595_v37 = vmax.f32 %v335_v24, %v536_v25  ;;  %v466_v24 = vunpack.c.l.b16 %v1297_v19  ;;  %v692_v25 = vunpack.c.l.b16 %v1383_v20 }
  0xad   : > { %v1046_v22 = vmax.f32 %v594_v16, %v1021_v21  ;;  %v1469_v21 = vld [vmem:[%s1643_s21 + $0x18c] sm:$0x3] }
  0xaf   : > { %v1071_v23 = vmax.f32 %v1046_v22, 0.0 }
  0xb0   : > { %v761_v26 = vpop.f32.mrf.mxu2  ;;  %v962_v27 = vpop.f32.mrf.mxu3 }
  0xb1   : > { %v1096_v30 = vpack.c.bf16 %v1071_v23, %v1071_v23  ;;  %v762_v31 = vadd.f32 %v1714_v41, %v761_v26  ;;  %v963_v32 = vadd.f32 %v1714_v41, %v962_v27  ;;  %v337_v33 = vpop.f32.mrf.mxu0  ;;  %v538_v34 = vpop.f32.mrf.mxu1  ;;  %v252_v23 = vunpack.c.l.b16 %v199_v18 }
  0xb2   : > { %v338_v40 = vadd.f32 %v1714_v41, %v337_v33  ;;  %v539_v42 = vadd.f32 %v1714_v41, %v538_v34  ;;  %v893_v27 = vunpack.c.l.b16 %v1469_v21  ;;  %v479_v34 = vpack.c.b16 %v466_v24, %v466_v24 }
  0xb3   : > { %1122 = vst.msk [vmem:[%s1732_s27 + $0x8] sm:$0xf] %vm1119_vm3, %v1096_v30  ;;  %v1022_v38 = vmax.f32 %v762_v31, %v963_v32  ;;  %v265_v33 = vpack.c.b16 %v252_v23, %v252_v23 }
  0xb4   : > { %1270 = vmatmul.msk.bf16.gmra.mxu0 %vm271_vm2, %v1544_v28  ;;  %1356 = vmatmul.msk.bf16.gmra.mxu1 %vm271_vm2, %v1556_v29  ;;  %v596_v47 = vmax.f32 %v338_v40, %v539_v42  ;;  %v906_v42 = vpack.c.b16 %v893_v27, %v893_v27 }
  0xb5   : > { %v1047_v39 = vmax.f32 %v595_v37, %v1022_v38  ;;  %1442 = vmatmul.msk.bf16.gmra.mxu2 %vm271_vm2, %v1568_v35  ;;  %1528 = vmatmul.msk.bf16.gmra.mxu3 %vm271_vm2, %v1580_v36  ;;  %v705_v35 = vpack.c.b16 %v692_v25, %v692_v25 }
  0xb7   : > { %v1072_v43 = vmax.f32 %v1047_v39, 0.0 }
  0xb8   : > { %v764_v44 = vpop.f32.mrf.mxu2  ;;  %v965_v45 = vpop.f32.mrf.mxu3 }
  0xb9   : > { %v1097_v46 = vpack.c.bf16 %v1072_v43, %v1072_v43  ;;  %v765_v48 = vadd.f32 %v1714_v41, %v764_v44  ;;  %v966_v49 = vadd.f32 %v1714_v41, %v965_v45  ;;  %v339_v50 = vpop.f32.mrf.mxu0  ;;  %v540_v51 = vpop.f32.mrf.mxu1 }
  0xba   : > { %v340_v55 = vadd.f32 %v1714_v41, %v339_v50  ;;  %v541_v56 = vadd.f32 %v1714_v41, %v540_v51 }
  0xbb   : > { %1123 = vst.msk [vmem:[%s1732_s27 + $0xc] sm:$0xf] %vm1119_vm3, %v1097_v46  ;;  %v1023_v52 = vmax.f32 %v765_v48, %v966_v49 }
  0xbc   : > { %v597_v4 = vmax.f32 %v340_v55, %v541_v56 }
  0xbd   : > { %v1048_v53 = vmax.f32 %v596_v47, %v1023_v52 }
  0xbf   : > { %v1073_v54 = vmax.f32 %v1048_v53, 0.0 }
  0xc0   : > { %v766_v57 = vpop.f32.mrf.mxu2  ;;  %v967_v58 = vpop.f32.mrf.mxu3 }
  0xc1   : > { %v1098_v61 = vpack.c.bf16 %v1073_v54, %v1073_v54  ;;  %v767_v62 = vadd.f32 %v1714_v41, %v766_v57  ;;  %v968_v63 = vadd.f32 %v1714_v41, %v967_v58  ;;  %v342_v0 = vpop.f32.mrf.mxu0  ;;  %v543_v1 = vpop.f32.mrf.mxu1 }
  0xc2   : > { %v343_v7 = vadd.f32 %v1714_v41, %v342_v0  ;;  %v544_v8 = vadd.f32 %v1714_v41, %v543_v1 }
  0xc3   : > { %1124 = vst.msk [vmem:[%s1732_s27 + $0x10] sm:$0xf] %vm1119_vm3, %v1098_v61  ;;  %v1024_v5 = vmax.f32 %v767_v62, %v968_v63 }
  0xc4   : > { %1271 = vmatmul.msk.bf16.gmra.mxu0 %vm271_vm2, %v1545_v59  ;;  %1357 = vmatmul.msk.bf16.gmra.mxu1 %vm271_vm2, %v1557_v60  ;;  %v598_v13 = vmax.f32 %v343_v7, %v544_v8 }
  0xc5   : > { %v1049_v6 = vmax.f32 %v597_v4, %v1024_v5  ;;  %1443 = vmatmul.msk.bf16.gmra.mxu2 %vm271_vm2, %v1569_v2  ;;  %1529 = vmatmul.msk.bf16.gmra.mxu3 %vm271_vm2, %v1581_v3 }
  0xc7   : > { %v1074_v9 = vmax.f32 %v1049_v6, 0.0 }
  0xc8   : > { %v769_v10 = vpop.f32.mrf.mxu2  ;;  %v970_v11 = vpop.f32.mrf.mxu3 }
  0xc9   : > { %v1099_v12 = vpack.c.bf16 %v1074_v9, %v1074_v9  ;;  %v770_v14 = vadd.f32 %v1714_v41, %v769_v10  ;;  %v971_v15 = vadd.f32 %v1714_v41, %v970_v11  ;;  %v344_v16 = vpop.f32.mrf.mxu0  ;;  %v545_v17 = vpop.f32.mrf.mxu1 }
  0xca   : > { %v345_v29 = vadd.f32 %v1714_v41, %v344_v16  ;;  %v546_v30 = vadd.f32 %v1714_v41, %v545_v17 }
  0xcb   : > { %1125 = vst.msk [vmem:[%s1732_s27 + $0x14] sm:$0xf] %vm1119_vm3, %v1099_v12  ;;  %v1025_v22 = vmax.f32 %v770_v14, %v971_v15 }
  0xcc   : > { %v599_v43 = vmax.f32 %v345_v29, %v546_v30 }
  0xcd   : > { %v1050_v26 = vmax.f32 %v598_v13, %v1025_v22 }
  0xcf   : > { %v1075_v28 = vmax.f32 %v1050_v26, 0.0 }
  0xd0   : > { %v771_v31 = vpop.f32.mrf.mxu2  ;;  %v972_v32 = vpop.f32.mrf.mxu3 }
  0xd1   : > { %v1100_v36 = vpack.c.bf16 %v1075_v28, %v1075_v28  ;;  %v772_v37 = vadd.f32 %v1714_v41, %v771_v31  ;;  %v973_v38 = vadd.f32 %v1714_v41, %v972_v32  ;;  %v347_v39 = vpop.f32.mrf.mxu0  ;;  %v548_v40 = vpop.f32.mrf.mxu1 }
  0xd2   : > { %v348_v46 = vadd.f32 %v1714_v41, %v347_v39  ;;  %v549_v47 = vadd.f32 %v1714_v41, %v548_v40 }
  0xd3   : > { %1126 = vst.msk [vmem:[%s1732_s27 + $0x18] sm:$0xf] %vm1119_vm3, %v1100_v36  ;;  %v1026_v44 = vmax.f32 %v772_v37, %v973_v38 }
  0xd4   : > { %1272 = vmatmul.msk.bf16.gmra.mxu0 %vm271_vm2, %v265_v33  ;;  %1358 = vmatmul.msk.bf16.gmra.mxu1 %vm271_vm2, %v479_v34  ;;  %v600_v52 = vmax.f32 %v348_v46, %v549_v47 }
  0xd5   : > { %v1051_v45 = vmax.f32 %v599_v43, %v1026_v44  ;;  %1444 = vmatmul.msk.bf16.gmra.mxu2 %vm271_vm2, %v705_v35  ;;  %1530 = vmatmul.msk.bf16.gmra.mxu3 %vm271_vm2, %v906_v42 }
  0xd7   : > { %v1076_v48 = vmax.f32 %v1051_v45, 0.0 }
  0xd8   : > { %v774_v49 = vpop.f32.mrf.mxu2  ;;  %v975_v50 = vpop.f32.mrf.mxu3 }
  0xd9   : > { %v1101_v51 = vpack.c.bf16 %v1076_v48, %v1076_v48  ;;  %v775_v53 = vadd.f32 %v1714_v41, %v774_v49  ;;  %v976_v54 = vadd.f32 %v1714_v41, %v975_v50  ;;  %v349_v55 = vpop.f32.mrf.mxu0  ;;  %v550_v56 = vpop.f32.mrf.mxu1 }
  0xda   : > { %v350_v60 = vadd.f32 %v1714_v41, %v349_v55  ;;  %v551_v61 = vadd.f32 %v1714_v41, %v550_v56 }
  0xdb   : > { %1127 = vst.msk [vmem:[%s1732_s27 + $0x1c] sm:$0xf] %vm1119_vm3, %v1101_v51  ;;  %v1027_v57 = vmax.f32 %v775_v53, %v976_v54 }
  0xdc   : > { %v601_v5 = vmax.f32 %v350_v60, %v551_v61 }
  0xdd   : > { %v1052_v58 = vmax.f32 %v600_v52, %v1027_v57 }
  0xdf   : > { %v1077_v59 = vmax.f32 %v1052_v58, 0.0 }
  0xe0   : > { %v776_v62 = vpop.f32.mrf.mxu2  ;;  %v977_v63 = vpop.f32.mrf.mxu3 }
  0xe1   : > { %v1102_v0 = vpack.c.bf16 %v1077_v59, %v1077_v59  ;;  %v777_v1 = vadd.f32 %v1714_v41, %v776_v62  ;;  %v978_v2 = vadd.f32 %v1714_v41, %v977_v63  ;;  %v352_v3 = vpop.f32.mrf.mxu0  ;;  %v553_v4 = vpop.f32.mrf.mxu1 }
  0xe2   : > { %v353_v8 = vadd.f32 %v1714_v41, %v352_v3  ;;  %v554_v9 = vadd.f32 %v1714_v41, %v553_v4 }
  0xe3   : > { %1128 = vst.msk [vmem:[%s1732_s27 + $0x20] sm:$0xf] %vm1119_vm3, %v1102_v0  ;;  %v1028_v6 = vmax.f32 %v777_v1, %v978_v2 }
  0xe4   : > { %v602_v14 = vmax.f32 %v353_v8, %v554_v9 }
  0xe5   : > { %v1053_v7 = vmax.f32 %v601_v5, %v1028_v6 }
  0xe7   : > { %v1078_v10 = vmax.f32 %v1053_v7, 0.0 }
  0xe8   : > { %v779_v11 = vpop.f32.mrf.mxu2  ;;  %v980_v12 = vpop.f32.mrf.mxu3 }
  0xe9   : > { %v1103_v13 = vpack.c.bf16 %v1078_v10, %v1078_v10  ;;  %v780_v15 = vadd.f32 %v1714_v41, %v779_v11  ;;  %v981_v16 = vadd.f32 %v1714_v41, %v980_v12  ;;  %v354_v17 = vpop.f32.mrf.mxu0  ;;  %v555_v18 = vpop.f32.mrf.mxu1 }
  0xea   : > { %v355_v22 = vadd.f32 %v1714_v41, %v354_v17  ;;  %v556_v23 = vadd.f32 %v1714_v41, %v555_v18 }
  0xeb   : > { %1129 = vst.msk [vmem:[%s1732_s27 + $0x24] sm:$0xf] %vm1119_vm3, %v1103_v13  ;;  %v1029_v19 = vmax.f32 %v780_v15, %v981_v16 }
  0xec   : > { %v603_v31 = vmax.f32 %v355_v22, %v556_v23 }
  0xed   : > { %v1054_v20 = vmax.f32 %v602_v14, %v1029_v19 }
  0xef   : > { %v1079_v21 = vmax.f32 %v1054_v20, 0.0 }
  0xf0   : > { %v781_v24 = vpop.f32.mrf.mxu2  ;;  %v982_v25 = vpop.f32.mrf.mxu3 }
  0xf1   : > { %v1104_v26 = vpack.c.bf16 %v1079_v21, %v1079_v21  ;;  %v782_v27 = vadd.f32 %v1714_v41, %v781_v24  ;;  %v983_v28 = vadd.f32 %v1714_v41, %v982_v25  ;;  %v357_v29 = vpop.f32.mrf.mxu0  ;;  %v558_v30 = vpop.f32.mrf.mxu1 }
  0xf2   : > { %v358_v34 = vadd.f32 %v1714_v41, %v357_v29  ;;  %v559_v35 = vadd.f32 %v1714_v41, %v558_v30 }
  0xf3   : > { %1130 = vst.msk [vmem:[%s1732_s27 + $0x28] sm:$0xf] %vm1119_vm3, %v1104_v26  ;;  %v1030_v32 = vmax.f32 %v782_v27, %v983_v28 }
  0xf4   : > { %v604_v40 = vmax.f32 %v358_v34, %v559_v35 }
  0xf5   : > { %v1055_v33 = vmax.f32 %v603_v31, %v1030_v32 }
  0xf7   : > { %v1080_v36 = vmax.f32 %v1055_v33, 0.0 }
  0xf8   : > { %v784_v37 = vpop.f32.mrf.mxu2  ;;  %v985_v38 = vpop.f32.mrf.mxu3 }
  0xf9   : > { %v1105_v39 = vpack.c.bf16 %v1080_v36, %v1080_v36  ;;  %v785_v42 = vadd.f32 %v1714_v41, %v784_v37  ;;  %v986_v43 = vadd.f32 %v1714_v41, %v985_v38  ;;  %v359_v44 = vpop.f32.mrf.mxu0  ;;  %v560_v45 = vpop.f32.mrf.mxu1 }
  0xfa   : > { %v360_v49 = vadd.f32 %v1714_v41, %v359_v44  ;;  %v561_v50 = vadd.f32 %v1714_v41, %v560_v45 }
  0xfb   : > { %1131 = vst.msk [vmem:[%s1732_s27 + $0x2c] sm:$0xf] %vm1119_vm3, %v1105_v39  ;;  %v1031_v46 = vmax.f32 %v785_v42, %v986_v43 }
  0xfc   : > { %v605_v58 = vmax.f32 %v360_v49, %v561_v50 }
  0xfd   : > { %v1056_v47 = vmax.f32 %v604_v40, %v1031_v46 }
  0xff   : > { %v1081_v48 = vmax.f32 %v1056_v47, 0.0 }
 0x100   : > { %v786_v51 = vpop.f32.mrf.mxu2  ;;  %v987_v52 = vpop.f32.mrf.mxu3 }
 0x101   : > { %v1106_v53 = vpack.c.bf16 %v1081_v48, %v1081_v48  ;;  %v787_v54 = vadd.f32 %v1714_v41, %v786_v51  ;;  %v988_v55 = vadd.f32 %v1714_v41, %v987_v52  ;;  %v362_v56 = vpop.f32.mrf.mxu0  ;;  %v563_v57 = vpop.f32.mrf.mxu1 }
 0x102   : > { %v363_v61 = vadd.f32 %v1714_v41, %v362_v56  ;;  %v564_v62 = vadd.f32 %v1714_v41, %v563_v57 }
 0x103   : > { %1132 = vst.msk [vmem:[%s1732_s27 + $0x30] sm:$0xf] %vm1119_vm3, %v1106_v53  ;;  %v1032_v59 = vmax.f32 %v787_v54, %v988_v55 }
 0x104   : > { %v606_v3 = vmax.f32 %v363_v61, %v564_v62 }
 0x105   : > { %v1057_v60 = vmax.f32 %v605_v58, %v1032_v59 }
 0x107   : > { %v1082_v63 = vmax.f32 %v1057_v60, 0.0 }
 0x108   : > { %v789_v0 = vpop.f32.mrf.mxu2  ;;  %v990_v1 = vpop.f32.mrf.mxu3 }
 0x109   : > { %v1107_v2 = vpack.c.bf16 %v1082_v63, %v1082_v63  ;;  %v790_v4 = vadd.f32 %v1714_v41, %v789_v0  ;;  %v991_v5 = vadd.f32 %v1714_v41, %v990_v1  ;;  %v364_v6 = vpop.f32.mrf.mxu0  ;;  %v565_v7 = vpop.f32.mrf.mxu1 }
 0x10a   : > { %v365_v11 = vadd.f32 %v1714_v41, %v364_v6  ;;  %v566_v12 = vadd.f32 %v1714_v41, %v565_v7 }
 0x10b   : > { %1133 = vst.msk [vmem:[%s1732_s27 + $0x34] sm:$0xf] %vm1119_vm3, %v1107_v2  ;;  %v1033_v8 = vmax.f32 %v790_v4, %v991_v5 }
 0x10c   : > { %v607_v20 = vmax.f32 %v365_v11, %v566_v12 }
 0x10d   : > { %v1058_v9 = vmax.f32 %v606_v3, %v1033_v8 }
 0x10f   : > { %v1083_v10 = vmax.f32 %v1058_v9, 0.0 }
 0x110   : > { %v791_v13 = vpop.f32.mrf.mxu2  ;;  %v992_v14 = vpop.f32.mrf.mxu3 }
 0x111   : > { %v1108_v15 = vpack.c.bf16 %v1083_v10, %v1083_v10  ;;  %v792_v16 = vadd.f32 %v1714_v41, %v791_v13  ;;  %v993_v17 = vadd.f32 %v1714_v41, %v992_v14  ;;  %v367_v18 = vpop.f32.mrf.mxu0  ;;  %v568_v19 = vpop.f32.mrf.mxu1 }
 0x112   : > { %v368_v23 = vadd.f32 %v1714_v41, %v367_v18  ;;  %v569_v24 = vadd.f32 %v1714_v41, %v568_v19 }
 0x113   : > { %1134 = vst.msk [vmem:[%s1732_s27 + $0x38] sm:$0xf] %vm1119_vm3, %v1108_v15  ;;  %v1034_v21 = vmax.f32 %v792_v16, %v993_v17 }
 0x114   : > { %v608_v29 = vmax.f32 %v368_v23, %v569_v24 }
 0x115   : > { %v1059_v22 = vmax.f32 %v607_v20, %v1034_v21 }
 0x117   : > { %v1084_v25 = vmax.f32 %v1059_v22, 0.0 }
 0x118   : > { %v794_v26 = vpop.f32.mrf.mxu2  ;;  %v995_v27 = vpop.f32.mrf.mxu3 }
 0x119   : > { %v1109_v28 = vpack.c.bf16 %v1084_v25, %v1084_v25  ;;  %v795_v30 = vadd.f32 %v1714_v41, %v794_v26  ;;  %v996_v31 = vadd.f32 %v1714_v41, %v995_v27  ;;  %v369_v32 = vpop.f32.mrf.mxu0  ;;  %v570_v33 = vpop.f32.mrf.mxu1 }
 0x11a   : > { %v370_v37 = vadd.f32 %v1714_v41, %v369_v32  ;;  %v571_v38 = vadd.f32 %v1714_v41, %v570_v33 }
 0x11b   : > { %1135 = vst.msk [vmem:[%s1732_s27 + $0x3c] sm:$0xf] %vm1119_vm3, %v1109_v28  ;;  %v1035_v34 = vmax.f32 %v795_v30, %v996_v31 }
 0x11c   : > { %v609_v47 = vmax.f32 %v370_v37, %v571_v38 }
 0x11d   : > { %v1060_v35 = vmax.f32 %v608_v29, %v1035_v34 }
 0x11f   : > { %v1085_v36 = vmax.f32 %v1060_v35, 0.0 }
 0x120   : > { %v796_v39 = vpop.f32.mrf.mxu2  ;;  %v997_v40 = vpop.f32.mrf.mxu3 }
 0x121   : > { %v1110_v42 = vpack.c.bf16 %v1085_v36, %v1085_v36  ;;  %v797_v43 = vadd.f32 %v1714_v41, %v796_v39  ;;  %v998_v44 = vadd.f32 %v1714_v41, %v997_v40  ;;  %v372_v45 = vpop.f32.mrf.mxu0  ;;  %v573_v46 = vpop.f32.mrf.mxu1 }
 0x122   : > { %v373_v50 = vadd.f32 %v1714_v41, %v372_v45  ;;  %v574_v51 = vadd.f32 %v1714_v41, %v573_v46 }
 0x123   : > { %1136 = vst.msk [vmem:[%s1732_s27 + $0x40] sm:$0xf] %vm1119_vm3, %v1110_v42  ;;  %v1036_v48 = vmax.f32 %v797_v43, %v998_v44 }
 0x124   : > { %v610_v56 = vmax.f32 %v373_v50, %v574_v51 }
 0x125   : > { %v1061_v49 = vmax.f32 %v609_v47, %v1036_v48 }
 0x127   : > { %v1086_v52 = vmax.f32 %v1061_v49, 0.0 }
 0x128   : > { %v799_v53 = vpop.f32.mrf.mxu2  ;;  %v1000_v54 = vpop.f32.mrf.mxu3 }
 0x129   : > { %v1111_v55 = vpack.c.bf16 %v1086_v52, %v1086_v52  ;;  %v800_v57 = vadd.f32 %v1714_v41, %v799_v53  ;;  %v1001_v58 = vadd.f32 %v1714_v41, %v1000_v54  ;;  %v374_v59 = vpop.f32.mrf.mxu0  ;;  %v575_v60 = vpop.f32.mrf.mxu1 }
 0x12a   : > { %v375_v0 = vadd.f32 %v1714_v41, %v374_v59  ;;  %v576_v1 = vadd.f32 %v1714_v41, %v575_v60 }
 0x12b   : > { %1137 = vst.msk [vmem:[%s1732_s27 + $0x44] sm:$0xf] %vm1119_vm3, %v1111_v55  ;;  %v1037_v61 = vmax.f32 %v800_v57, %v1001_v58 }
 0x12c   : > { %v611_v9 = vmax.f32 %v375_v0, %v576_v1 }
 0x12d   : > { %v1062_v62 = vmax.f32 %v610_v56, %v1037_v61 }
 0x12f   : > { %v1087_v63 = vmax.f32 %v1062_v62, 0.0 }
 0x130   : > { %v801_v2 = vpop.f32.mrf.mxu2  ;;  %v1002_v3 = vpop.f32.mrf.mxu3 }
 0x131   : > { %v1112_v4 = vpack.c.bf16 %v1087_v63, %v1087_v63  ;;  %v802_v5 = vadd.f32 %v1714_v41, %v801_v2  ;;  %v1003_v6 = vadd.f32 %v1714_v41, %v1002_v3  ;;  %v377_v7 = vpop.f32.mrf.mxu0  ;;  %v578_v8 = vpop.f32.mrf.mxu1 }
 0x132   : > { %v378_v12 = vadd.f32 %v1714_v41, %v377_v7  ;;  %v579_v13 = vadd.f32 %v1714_v41, %v578_v8 }
 0x133   : > { %1138 = vst.msk [vmem:[%s1732_s27 + $0x48] sm:$0xf] %vm1119_vm3, %v1112_v4  ;;  %v1038_v10 = vmax.f32 %v802_v5, %v1003_v6 }
 0x134   : > { %v612_v18 = vmax.f32 %v378_v12, %v579_v13 }
 0x135   : > { %v1063_v11 = vmax.f32 %v611_v9, %v1038_v10 }
 0x137   : > { %v1088_v14 = vmax.f32 %v1063_v11, 0.0 }
 0x138   : > { %v804_v15 = vpop.f32.mrf.mxu2  ;;  %v1005_v16 = vpop.f32.mrf.mxu3 }
 0x139   : > { %v1113_v17 = vpack.c.bf16 %v1088_v14, %v1088_v14  ;;  %v805_v19 = vadd.f32 %v1714_v41, %v804_v15  ;;  %v1006_v20 = vadd.f32 %v1714_v41, %v1005_v16  ;;  %v379_v21 = vpop.f32.mrf.mxu0  ;;  %v580_v22 = vpop.f32.mrf.mxu1 }
 0x13a   : > { %v380_v26 = vadd.f32 %v1714_v41, %v379_v21  ;;  %v581_v27 = vadd.f32 %v1714_v41, %v580_v22 }
 0x13b   : > { %1139 = vst.msk [vmem:[%s1732_s27 + $0x4c] sm:$0xf] %vm1119_vm3, %v1113_v17  ;;  %v1039_v23 = vmax.f32 %v805_v19, %v1006_v20 }
 0x13c   : > { %v613_v35 = vmax.f32 %v380_v26, %v581_v27 }
 0x13d   : > { %v1064_v24 = vmax.f32 %v612_v18, %v1039_v23 }
 0x13f   : > { %v1089_v25 = vmax.f32 %v1064_v24, 0.0 }
 0x140   : > { %v806_v28 = vpop.f32.mrf.mxu2  ;;  %v1007_v29 = vpop.f32.mrf.mxu3 }
 0x141   : > { %v1114_v30 = vpack.c.bf16 %v1089_v25, %v1089_v25  ;;  %v807_v31 = vadd.f32 %v1714_v41, %v806_v28  ;;  %v1008_v32 = vadd.f32 %v1714_v41, %v1007_v29  ;;  %v382_v33 = vpop.f32.mrf.mxu0  ;;  %v583_v34 = vpop.f32.mrf.mxu1 }
 0x142   : > { %v383_v38 = vadd.f32 %v1714_v41, %v382_v33  ;;  %v584_v39 = vadd.f32 %v1714_v41, %v583_v34 }
 0x143   : > { %1140 = vst.msk [vmem:[%s1732_s27 + $0x50] sm:$0xf] %vm1119_vm3, %v1114_v30  ;;  %v1040_v36 = vmax.f32 %v807_v31, %v1008_v32 }
 0x144   : > { %v614_v45 = vmax.f32 %v383_v38, %v584_v39 }
 0x145   : > { %v1065_v37 = vmax.f32 %v613_v35, %v1040_v36 }
 0x147   : > { %v1090_v40 = vmax.f32 %v1065_v37, 0.0 }
 0x148   : > { %v809_v42 = vpop.f32.mrf.mxu2  ;;  %v1010_v43 = vpop.f32.mrf.mxu3 }
 0x149   : > { %v1115_v44 = vpack.c.bf16 %v1090_v40, %v1090_v40  ;;  %v810_v46 = vadd.f32 %v1714_v41, %v809_v42  ;;  %v1011_v47 = vadd.f32 %v1714_v41, %v1010_v43  ;;  %v384_v48 = vpop.f32.mrf.mxu0  ;;  %v585_v49 = vpop.f32.mrf.mxu1 }
 0x14a   : > { %v385_v53 = vadd.f32 %v1714_v41, %v384_v48  ;;  %v586_v54 = vadd.f32 %v1714_v41, %v585_v49 }
 0x14b   : > { %1141 = vst.msk [vmem:[%s1732_s27 + $0x54] sm:$0xf] %vm1119_vm3, %v1115_v44  ;;  %v1041_v50 = vmax.f32 %v810_v46, %v1011_v47 }
 0x14c   : > { %v615_v62 = vmax.f32 %v385_v53, %v586_v54 }
 0x14d   : > { %v1066_v51 = vmax.f32 %v614_v45, %v1041_v50 }
 0x14f   : > { %v1091_v52 = vmax.f32 %v1066_v51, 0.0 }
 0x150   : > { %v811_v55 = vpop.f32.mrf.mxu2  ;;  %v1012_v56 = vpop.f32.mrf.mxu3 }
 0x151   : > { %v1116_v57 = vpack.c.bf16 %v1091_v52, %v1091_v52  ;;  %v812_v58 = vadd.f32 %v1714_v41, %v811_v55  ;;  %v1013_v59 = vadd.f32 %v1714_v41, %v1012_v56  ;;  %v387_v60 = vpop.f32.mrf.mxu0  ;;  %v588_v61 = vpop.f32.mrf.mxu1 }
 0x152   : > { %v388_v1 = vadd.f32 %v1714_v41, %v387_v60  ;;  %v589_v2 = vadd.f32 %v1714_v41, %v588_v61 }
 0x153   : > { %1142 = vst.msk [vmem:[%s1732_s27 + $0x58] sm:$0xf] %vm1119_vm3, %v1116_v57  ;;  %v1042_v63 = vmax.f32 %v812_v58, %v1013_v59 }
 0x154   : > { %v616_v7 = vmax.f32 %v388_v1, %v589_v2 }
 0x155   : > { %v1067_v0 = vmax.f32 %v615_v62, %v1042_v63 }
 0x157   : > { %v1092_v3 = vmax.f32 %v1067_v0, 0.0 }
 0x158   : > { %v814_v4 = vpop.f32.mrf.mxu2  ;;  %v1015_v5 = vpop.f32.mrf.mxu3 }
 0x159   : > { %v1117_v6 = vpack.c.bf16 %v1092_v3, %v1092_v3  ;;  %v815_v8 = vadd.f32 %v1714_v41, %v814_v4  ;;  %v1016_v9 = vadd.f32 %v1714_v41, %v1015_v5  ;;  %v389_v10 = vpop.f32.mrf.mxu0  ;;  %v590_v11 = vpop.f32.mrf.mxu1 }
 0x15b   : > { %1143 = vst.msk [vmem:[%s1732_s27 + $0x5c] sm:$0xf] %vm1119_vm3, %v1117_v6  ;;  %v1043_v12 = vmax.f32 %v815_v8, %v1016_v9 }
 0x15d   : > { %v1068_v13 = vmax.f32 %v616_v7, %v1043_v12 }
 0x15f   : > { %v1093_v14 = vmax.f32 %v1068_v13, 0.0 }
 0x160   : > { %v816_v15 = vpop.f32.mrf.mxu2  ;;  %v1017_v16 = vpop.f32.mrf.mxu3 }
 0x161   : > { %v1118_v17 = vpack.c.bf16 %v1093_v14, %v1093_v14 }
 0x163   : > { %1145 = vst.msk [vmem:[%s1732_s27 + $0x60] sm:$0x3] %vm1144_vm4, %v1118_v17 }
 0x164 PF: > { %s13_s12 = sadd.s32 1, %s1600_s12  }
 0x165   : > { %p10_p4 = scmp.ge.s32.totalorder %s13_s12, 4  }
 0x167   :  { %12 = sbr.rel (!%p10_p4) target bundleno = 1 (0x1), region = 65 }

// kernel: cnn_forward.4
= control target key start
LH: loop header
LB: loop body
LE: loop exit
PB: predicated region body
PF: predicated region fallthrough
CT: control target
= control target key end

     0   :  { %s2200_s12 = smov 0   ;;  %s2897_s0 = inlined_call_operand.vmem [shape: bf16[2,4,25,800], index: 0, kind: input, shape index: {}]   ;;  %s2898_s1 = inlined_call_operand.vmem [shape: bf16[800,64], index: 1, kind: input, shape index: {}]   ;;  %s2899_s2 = inlined_call_operand.vmem [shape: f32[1,64], index: 2, kind: input, shape index: {}]   ;;  %s2900_s3 = inlined_call_operand.vmem [shape: bf16[2,25,64], index: 3, kind: output, shape index: {}]  }
   0x1 LB: > { %s1565_s13 = sadd.s32 4294967295, %s2178_s12   ;;  %p1569_p0 = scmp.ge.s32.totalorder %s2178_s12, 1  ;;  %s2178_s12 = sphi %s2200_s12, %s13_s12  }
   0x2   : > { %p137_p1 = scmp.lt.s32.totalorder %s2178_s12, 3 }
   0x4   : > { %p138_p2 = pnand %p1569_p0, %p137_p1 }
   0x5   : > { %p161_p3 = scmp.lt.s32.totalorder (!%p138_p2), %s1565_s13, 1 }
   0x6   : > { %141 = sbr.rel (%p138_p2) target bundleno = 410 (0x19a), region = 32 }
   0xb   : > { %v2211_v0 = vld [vmem:[%s2898_s1 + $0x38] sm:$0xff]  ;;  %v2233_v4 = vld [vmem:[%s2898_s1 + $0x30] sm:$0xff]  ;;  %v2257_v8 = vld [vmem:[%s2898_s1 + $0x28] sm:$0xff]  ;;  %s2903_s13 = smov (!%p161_p3, %s1565_s13), 1  ;;  %vm662_vm0 = vcmask 261120   ;;  %vm1500_vm1 = vcmask 519168  }
   0xc   : > { %v2216_v1 = vld [vmem:[%s2898_s1 + $0x78] sm:$0xff]  ;;  %669 = vmatpush.bf16.msra.mxu0 %v2211_v0  ;;  %v2238_v5 = vld [vmem:[%s2898_s1 + $0x70] sm:$0xff]  ;;  %v2262_v9 = vld [vmem:[%s2898_s1 + $0x68] sm:$0xff]  ;;  %s2162_s6 = smul.u32 448, %s2903_s13  ;;  %vm1504_vm2 = vcmask 516096  }
   0xd   : > { %v2221_v2 = vld [vmem:[%s2898_s1 + $0xb8] sm:$0xff]  ;;  %688 = vmatpush.bf16.msra.mxu1 %v2216_v1  ;;  %v2245_v6 = vld [vmem:[%s2898_s1 + $0xb0] sm:$0xff]  ;;  %v2269_v10 = vld [vmem:[%s2898_s1 + $0xa8] sm:$0xff]  ;;  %vm1505_vm3 = vsmask.f32 256 }
   0xe   : > { %v2226_v3 = vld [vmem:[%s2898_s1 + $0xf8] sm:$0xff]  ;;  %707 = vmatpush.bf16.msra.mxu2 %v2221_v2  ;;  %v2250_v7 = vld [vmem:[%s2898_s1 + $0xf0] sm:$0xff]  ;;  %v2274_v11 = vld [vmem:[%s2898_s1 + $0xe8] sm:$0xff]  ;;  %s2370_s19 = scalar_lea.vmem %s2897_s0, %s2162_s6 }
   0xf   : > { %726 = vmatpush.bf16.msra.mxu3 %v2226_v3  ;;  %v2281_v12 = vld [vmem:[%s2898_s1 + $0x20] sm:$0xff]  ;;  %v2307_v16 = vld [vmem:[%s2898_s1 + $0x18] sm:$0xff]  ;;  %v2335_v20 = vld [vmem:[%s2898_s1 + $0x10] sm:$0xff] }
  0x10   : > { %670 = vmatpush.bf16.msra.mxu0 %v2233_v4  ;;  %v2286_v13 = vld [vmem:[%s2898_s1 + $0x60] sm:$0xff]  ;;  %v2312_v17 = vld [vmem:[%s2898_s1 + $0x58] sm:$0xff]  ;;  %v2340_v21 = vld [vmem:[%s2898_s1 + $0x50] sm:$0xff] }
  0x11   : > { %689 = vmatpush.bf16.msra.mxu1 %v2238_v5  ;;  %v2295_v14 = vld [vmem:[%s2898_s1 + $0xa0] sm:$0xff]  ;;  %v2323_v18 = vld [vmem:[%s2898_s1 + $0x98] sm:$0xff]  ;;  %v2348_v22 = vld [vmem:[%s2898_s1 + $0x90] sm:$0xff] }
  0x12   : > { %708 = vmatpush.bf16.msra.mxu2 %v2245_v6  ;;  %v2300_v15 = vld [vmem:[%s2898_s1 + $0xe0] sm:$0xff]  ;;  %v2328_v19 = vld [vmem:[%s2898_s1 + $0xd8] sm:$0xff]  ;;  %v2353_v23 = vld [vmem:[%s2898_s1 + $0xd0] sm:$0xff] }
  0x13   : > { %727 = vmatpush.bf16.msra.mxu3 %v2250_v7  ;;  %v2360_v24 = vld [vmem:[%s2898_s1 + $0x8] sm:$0xff]  ;;  %v2387_v28 = vld [vmem:[%s2898_s1] sm:$0xff]  ;;  %v2109_v33 = vld [vmem:[%s2370_s19 + $0x18] sm:$0xf0] }
  0x14   : > { %671 = vmatpush.bf16.msra.mxu0 %v2257_v8  ;;  %v2365_v25 = vld [vmem:[%s2898_s1 + $0x48] sm:$0xff]  ;;  %v2392_v29 = vld [vmem:[%s2898_s1 + $0x40] sm:$0xff]  ;;  %v2424_v41 = vld [vmem:[%s2898_s1 + $0x138] sm:$0xff] }
  0x15   : > { %690 = vmatpush.bf16.msra.mxu1 %v2262_v9  ;;  %v2377_v26 = vld [vmem:[%s2898_s1 + $0x88] sm:$0xff]  ;;  %v2397_v30 = vld [vmem:[%s2898_s1 + $0x80] sm:$0xff]  ;;  %v2433_v46 = vld [vmem:[%s2898_s1 + $0x178] sm:$0xff] }
  0x16   : > { %709 = vmatpush.bf16.msra.mxu2 %v2269_v10  ;;  %v2382_v27 = vld [vmem:[%s2898_s1 + $0xc8] sm:$0xff]  ;;  %v2402_v31 = vld [vmem:[%s2898_s1 + $0xc0] sm:$0xff]  ;;  %v2440_v47 = vld [vmem:[%s2898_s1 + $0x130] sm:$0xff] }
  0x17   : > { %728 = vmatpush.bf16.msra.mxu3 %v2274_v11  ;;  %v1575_v32 = vld [vmem:[%s2370_s19] sm:$0xf]  ;;  %v2106_v34 = vld [vmem:[%s2370_s19 + $0x4] sm:$0xf]  ;;  %v1583_v36 = vld [vmem:[%s2370_s19 + $0x8] sm:$0xf] }
  0x18   : > { %672 = vmatpush.bf16.msra.mxu0 %v2281_v12  ;;  %v1577_v35 = vld [vmem:[%s2370_s19 + $0x1c] sm:$0xf0]  ;;  %v2110_v37 = vld [vmem:[%s2370_s19 + $0x20] sm:$0xf0]  ;;  %v2107_v38 = vld [vmem:[%s2370_s19 + $0xc] sm:$0xf]  ;;  %v1576_v42 = vor.u32 %v2109_v33, %v1575_v32 }
  0x19   : > { %691 = vmatpush.bf16.msra.mxu1 %v2286_v13  ;;  %v1585_v39 = vld [vmem:[%s2370_s19 + $0x24] sm:$0xf0]  ;;  %v1580_v43 = vor.u32 %v2106_v34, %v1577_v35  ;;  %v1584_v44 = vor.u32 %v2110_v37, %v1583_v36  ;;  %v2445_v48 = vld [vmem:[%s2898_s1 + $0x180] sm:$0xff]  ;;  %v2452_v49 = vld [vmem:[%s2898_s1 + $0x170] sm:$0xff] }
  0x1a   : > { %710 = vmatpush.bf16.msra.mxu2 %v2295_v14  ;;  %v2419_v40 = vld [vmem:[%s2898_s1 + $0x188] sm:$0xff]  ;;  %v1588_v45 = vor.u32 %v2107_v38, %v1585_v39  ;;  %v2473_v52 = vld [vmem:[%s2898_s1 + $0x120] sm:$0xff]  ;;  %v1603_v54 = vld [vmem:[%s2370_s19 + $0x38] sm:$0xf] }
  0x1b   : > { %729 = vmatpush.bf16.msra.mxu3 %v2300_v15  ;;  %v2458_v50 = vld [vmem:[%s2898_s1 + $0x128] sm:$0xff]  ;;  %v2478_v53 = vld [vmem:[%s2898_s1 + $0x160] sm:$0xff]  ;;  %v2116_v55 = vld [vmem:[%s2370_s19 + $0x50] sm:$0x10] }
  0x1c   : > { %673 = vmatpush.bf16.msra.mxu0 %v2307_v16  ;;  %v2467_v51 = vld [vmem:[%s2898_s1 + $0x168] sm:$0xff]  ;;  %v2113_v56 = vld [vmem:[%s2370_s19 + $0x3c] sm:$0xf]  ;;  %v1605_v57 = vld [vmem:[%s2370_s19 + $0x54] sm:$0x10]  ;;  %v1604_v63 = vor.u32 %v2116_v55, %v1603_v54 }
  0x1d   : > { %692 = vmatpush.bf16.msra.mxu1 %v2312_v17  ;;  %v1611_v58 = vld [vmem:[%s2370_s19 + $0x40] sm:$0xf]  ;;  %v2117_v59 = vld [vmem:[%s2370_s19 + $0x58] sm:$0x10]  ;;  %v2114_v60 = vld [vmem:[%s2370_s19 + $0x44] sm:$0xf]  ;;  %v1608_v32 = vor.u32 %v2113_v56, %v1605_v57 }
  0x1e   : > { %711 = vmatpush.bf16.msra.mxu2 %v2323_v18  ;;  %v1613_v61 = vld [vmem:[%s2370_s19 + $0x5c] sm:$0x10]  ;;  %v2495_v62 = vld [vmem:[%s2898_s1 + $0x118] sm:$0xff]  ;;  %v1612_v33 = vor.u32 %v2117_v59, %v1611_v58  ;;  %v2509_v36 = vld [vmem:[%s2898_s1 + $0x110] sm:$0xff] }
  0x1f   : > { %730 = vmatpush.bf16.msra.mxu3 %v2328_v19  ;;  %v1616_v34 = vor.u32 %v2114_v60, %v1613_v61  ;;  %v2503_v35 = vld [vmem:[%s2898_s1 + $0x158] sm:$0xff]  ;;  %v2516_v37 = vld [vmem:[%s2898_s1 + $0x150] sm:$0xff]  ;;  %v2522_v38 = vld [vmem:[%s2898_s1 + $0x108] sm:$0xff] }
  0x20   : > { %674 = vmatpush.bf16.msra.mxu0 %v2335_v20  ;;  %v2530_v39 = vld [vmem:[%s2898_s1 + $0x148] sm:$0xff]  ;;  %v2108_v54 = vld [vmem:[%s2370_s19 + $0x14] sm:$0xf]  ;;  %v1593_v55 = vld [vmem:[%s2370_s19 + $0x2c] sm:$0xf0] }
  0x21   : > { %693 = vmatpush.bf16.msra.mxu1 %v2340_v21  ;;  %v1599_v56 = vld [vmem:[%s2370_s19 + $0x18] sm:$0xf]  ;;  %v2112_v57 = vld [vmem:[%s2370_s19 + $0x30] sm:$0xf0]  ;;  %v1849_v58 = vld [vmem:[%s2370_s19 + $0x70] sm:$0xf]  ;;  %v1596_v61 = vor.u32 %v2108_v54, %v1593_v55 }
  0x22   : > { %712 = vmatpush.bf16.msra.mxu2 %v2348_v22  ;;  %v2123_v59 = vld [vmem:[%s2370_s19 + $0x88] sm:$0xf0]  ;;  %v1627_v54 = vld [vmem:[%s2370_s19 + $0x50] sm:$0xf]  ;;  %vm1506_vm4 = vmand %vm1504_vm2, %vm1505_vm3 }
  0x23   : > { %731 = vmatpush.bf16.msra.mxu3 %v2353_v23  ;;  %v2119_v55 = vld [vmem:[%s2370_s19 + $0x68] sm:$0x10] }
  0x24   : > { %675 = vmatpush.bf16.msra.mxu0 %v2360_v24 }
  0x25   : > { %694 = vmatpush.bf16.msra.mxu1 %v2365_v25 }
  0x26   : > { %713 = vmatpush.bf16.msra.mxu2 %v2377_v26 }
  0x27   : > { %732 = vmatpush.bf16.msra.mxu3 %v2382_v27 }
  0x28   : > { %676 = vmatpush.bf16.msra.mxu0 %v2387_v28 }
  0x29   : > { %695 = vmatpush.bf16.msra.mxu1 %v2392_v29 }
  0x2a   : > { %714 = vmatpush.bf16.msra.mxu2 %v2397_v30 }
  0x2b   : > { %733 = vmatpush.bf16.msra.mxu3 %v2402_v31  ;;  %677 = vmatmul.bf16.vlgmr.msra.gmra.mxu0 %v1576_v42  ;;  %v2536_v42 = vld [vmem:[%s2898_s1 + $0x100] sm:$0xff] }
  0x2c   : > { %745 = vmatpush.bf16.msrb.mxu0 %v2424_v41  ;;  %696 = vmatmul.bf16.vlgmr.msra.gmra.mxu1 %v1580_v43  ;;  %v2542_v43 = vld [vmem:[%s2898_s1 + $0x140] sm:$0xff] }
  0x2d   : > { %715 = vmatmul.bf16.vlgmr.msra.gmra.mxu2 %v1584_v44  ;;  %764 = vmatpush.bf16.msrb.mxu1 %v2433_v46  ;;  %v1591_v44 = vld [vmem:[%s2370_s19 + $0x10] sm:$0xf] }
  0x2e   : > { %789 = vmatpush.bf16.msrb.mxu2 %v2419_v40  ;;  %734 = vmatmul.bf16.vlgmr.msra.gmra.mxu3 %v1588_v45  ;;  %v2111_v45 = vld [vmem:[%s2370_s19 + $0x28] sm:$0xf0] }
  0x2f   : > { %895 = vmatpush.bf16.msrb.mxu3 %v2211_v0  ;;  %v1592_v60 = vor.u32 %v2111_v45, %v1591_v44  ;;  %v2115_v44 = vld [vmem:[%s2370_s19 + $0x4c] sm:$0xf]  ;;  %v1621_v45 = vld [vmem:[%s2370_s19 + $0x64] sm:$0x10] }
  0x30   : > { %746 = vmatpush.bf16.msrb.mxu0 %v2440_v47 }
  0x31   : > { %765 = vmatpush.bf16.msrb.mxu1 %v2452_v49 }
  0x32   : > { %790 = vmatpush.bf16.msrb.mxu2 %v2445_v48 }
  0x33   : > { %896 = vmatpush.bf16.msrb.mxu3 %v2233_v4 }
  0x34   : > { %747 = vmatpush.bf16.msrb.mxu0 %v2458_v50 }
  0x35   : > { %766 = vmatpush.bf16.msrb.mxu1 %v2467_v51 }
  0x36   : > { %952 = vmatpush.bf16.msra.mxu2 %v2226_v3 }
  0x37   : > { %897 = vmatpush.bf16.msrb.mxu3 %v2257_v8 }
  0x38   : > { %748 = vmatpush.bf16.msrb.mxu0 %v2473_v52 }
  0x39   : > { %767 = vmatpush.bf16.msrb.mxu1 %v2478_v53 }
  0x3a   : > { %953 = vmatpush.bf16.msra.mxu2 %v2250_v7 }
  0x3b   : > { %898 = vmatpush.bf16.msrb.mxu3 %v2281_v12  ;;  %682 = vmatmul.bf16.gmra.mxu0 %v1604_v63  ;;  %v1600_v63 = vor.u32 %v2112_v57, %v1599_v56  ;;  %v1877_v56 = vld [vmem:[%s2370_s19 + $0xa8] sm:$0xf]  ;;  %v2130_v57 = vld [vmem:[%s2370_s19 + $0xc0] sm:$0x10] }
  0x3c   : > { %749 = vmatpush.bf16.msrb.mxu0 %v2495_v62  ;;  %701 = vmatmul.bf16.gmra.mxu1 %v1608_v32  ;;  %v1850_v32 = vor.u32 %v2123_v59, %v1849_v58  ;;  %v1624_v59 = vor.u32 %v2115_v44, %v1621_v45  ;;  %v2121_v44 = vld [vmem:[%s2370_s19 + $0x7c] sm:$0xf]  ;;  %v1859_v45 = vld [vmem:[%s2370_s19 + $0x94] sm:$0xf0] }
  0x3d   : > { %720 = vmatmul.bf16.gmra.mxu2 %v1612_v33  ;;  %768 = vmatpush.bf16.msrb.mxu1 %v2503_v35  ;;  %v1619_v33 = vld [vmem:[%s2370_s19 + $0x48] sm:$0xf] }
  0x3e   : > { %954 = vmatpush.bf16.msra.mxu2 %v2274_v11  ;;  %739 = vmatmul.bf16.gmra.mxu3 %v1616_v34  ;;  %v2118_v34 = vld [vmem:[%s2370_s19 + $0x60] sm:$0x10] }
  0x3f   : > { %899 = vmatpush.bf16.msrb.mxu3 %v2307_v16  ;;  %v1620_v58 = vor.u32 %v2118_v34, %v1619_v33  ;;  %v1857_v33 = vld [vmem:[%s2370_s19 + $0x78] sm:$0xf]  ;;  %v2124_v34 = vld [vmem:[%s2370_s19 + $0x90] sm:$0xf0] }
  0x40   : > { %750 = vmatpush.bf16.msrb.mxu0 %v2509_v36 }
  0x41   : > { %769 = vmatpush.bf16.msrb.mxu1 %v2516_v37 }
  0x42   : > { %955 = vmatpush.bf16.msra.mxu2 %v2300_v15 }
  0x43   : > { %900 = vmatpush.bf16.msrb.mxu3 %v2335_v20 }
  0x44   : > { %751 = vmatpush.bf16.msrb.mxu0 %v2522_v38 }
  0x45   : > { %770 = vmatpush.bf16.msrb.mxu1 %v2530_v39 }
  0x46   : > { %956 = vmatpush.bf16.msra.mxu2 %v2328_v19 }
  0x47   : > { %901 = vmatpush.bf16.msrb.mxu3 %v2360_v24 }
  0x48   : > { %752 = vmatpush.bf16.msrb.mxu0 %v2536_v42 }
  0x49   : > { %771 = vmatpush.bf16.msrb.mxu1 %v2542_v43 }
  0x4a   : > { %957 = vmatpush.bf16.msra.mxu2 %v2353_v23 }
  0x4b   : > { %902 = vmatpush.bf16.msrb.mxu3 %v2387_v28  ;;  %753 = vmatmul.bf16.vlgmr.msrb.gmra.mxu0 %v1592_v60  ;;  %v1628_v60 = vor.u32 %v2119_v55, %v1627_v54  ;;  %v1865_v54 = vld [vmem:[%s2370_s19 + $0x80] sm:$0xf]  ;;  %v2125_v55 = vld [vmem:[%s2370_s19 + $0x98] sm:$0xf0] }
  0x4c   : > { %914 = vmatpush.bf16.msra.mxu0 %v2216_v1  ;;  %772 = vmatmul.bf16.vlgmr.msrb.gmra.mxu1 %v1596_v61  ;;  %v1878_v61 = vor.u32 %v2130_v57, %v1877_v56  ;;  %v1858_v57 = vor.u32 %v2124_v34, %v1857_v33  ;;  %v2128_v33 = vld [vmem:[%s2370_s19 + $0xb4] sm:$0xf]  ;;  %v1887_v34 = vld [vmem:[%s2370_s19 + $0xcc] sm:$0x10] }
  0x4d   : > { %933 = vmatpush.bf16.msra.mxu1 %v2221_v2  ;;  %1829 = vmatmul.msk.bf16.vlgmr.msrb.gmra.mxu2 %vm662_vm0, %v1600_v63  ;;  %v2120_v63 = vld [vmem:[%s2370_s19 + $0x74] sm:$0xf] }
  0x4e   : > { %958 = vmatpush.bf16.msra.mxu2 %v2382_v27  ;;  %903 = vmatmul.bf16.vlgmr.msrb.gmra.mxu3 %v1850_v32  ;;  %v1851_v32 = vld [vmem:[%s2370_s19 + $0x8c] sm:$0xf0] }
  0x4f   : > { %971 = vmatpush.bf16.msra.mxu3 %v2424_v41  ;;  %v1854_v56 = vor.u32 %v2120_v63, %v1851_v32  ;;  %v1885_v63 = vld [vmem:[%s2370_s19 + $0xb0] sm:$0xf]  ;;  %v2131_v32 = vld [vmem:[%s2370_s19 + $0xc8] sm:$0x10] }
  0x50   : > { %915 = vmatpush.bf16.msra.mxu0 %v2238_v5 }
  0x51   : > { %934 = vmatpush.bf16.msra.mxu1 %v2245_v6 }
  0x52   : > { %959 = vmatpush.bf16.msra.mxu2 %v2402_v31 }
  0x53   : > { %972 = vmatpush.bf16.msra.mxu3 %v2440_v47 }
  0x54   : > { %916 = vmatpush.bf16.msra.mxu0 %v2262_v9 }
  0x55   : > { %935 = vmatpush.bf16.msra.mxu1 %v2269_v10 }
  0x56   : > { %1125 = vmatpush.bf16.msrb.mxu2 %v2211_v0 }
  0x57   : > { %973 = vmatpush.bf16.msra.mxu3 %v2458_v50 }
  0x58   : > { %917 = vmatpush.bf16.msra.mxu0 %v2286_v13 }
  0x59   : > { %936 = vmatpush.bf16.msra.mxu1 %v2295_v14 }
  0x5a   : > { %1126 = vmatpush.bf16.msrb.mxu2 %v2233_v4 }
  0x5b   : > { %974 = vmatpush.bf16.msra.mxu3 %v2473_v52  ;;  %758 = vmatmul.bf16.gmra.mxu0 %v1620_v58  ;;  %v1862_v58 = vor.u32 %v2121_v44, %v1859_v45  ;;  %v1893_v44 = vld [vmem:[%s2370_s19 + $0xb8] sm:$0xf]  ;;  %v2132_v45 = vld [vmem:[%s2370_s19 + $0xd0] sm:$0x10] }
  0x5c   : > { %918 = vmatpush.bf16.msra.mxu0 %v2312_v17  ;;  %777 = vmatmul.bf16.gmra.mxu1 %v1624_v59  ;;  %v1866_v59 = vor.u32 %v2125_v55, %v1865_v54  ;;  %v1886_v55 = vor.u32 %v2131_v32, %v1885_v63  ;;  %v1923_v63 = vld [vmem:[%s2370_s19 + $0xe0] sm:$0xf]  ;;  %v2137_v32 = vld [vmem:[%s2370_s19 + $0xf8] sm:$0xf0] }
  0x5d   : > { %937 = vmatpush.bf16.msra.mxu1 %v2323_v18  ;;  %1830 = vmatmul.msk.bf16.gmra.mxu2 %vm662_vm0, %v1628_v60  ;;  %v2127_v60 = vld [vmem:[%s2370_s19 + $0xac] sm:$0xf] }
  0x5e   : > { %1127 = vmatpush.bf16.msrb.mxu2 %v2257_v8  ;;  %908 = vmatmul.bf16.gmra.mxu3 %v1878_v61  ;;  %v1879_v61 = vld [vmem:[%s2370_s19 + $0xc4] sm:$0x10] }
  0x5f   : > { %975 = vmatpush.bf16.msra.mxu3 %v2495_v62  ;;  %v1882_v54 = vor.u32 %v2127_v60, %v1879_v61  ;;  %v1873_v60 = vld [vmem:[%s2370_s19 + $0x88] sm:$0xf]  ;;  %v2126_v61 = vld [vmem:[%s2370_s19 + $0xa0] sm:$0xf0] }
  0x60   : > { %919 = vmatpush.bf16.msra.mxu0 %v2340_v21 }
  0x61   : > { %938 = vmatpush.bf16.msra.mxu1 %v2348_v22 }
  0x62   : > { %1128 = vmatpush.bf16.msrb.mxu2 %v2281_v12 }
  0x63   : > { %976 = vmatpush.bf16.msra.mxu3 %v2509_v36 }
  0x64   : > { %920 = vmatpush.bf16.msra.mxu0 %v2365_v25 }
  0x65   : > { %939 = vmatpush.bf16.msra.mxu1 %v2377_v26 }
  0x66   : > { %1129 = vmatpush.bf16.msrb.mxu2 %v2307_v16 }
  0x67   : > { %977 = vmatpush.bf16.msra.mxu3 %v2522_v38 }
  0x68   : > { %921 = vmatpush.bf16.msra.mxu0 %v2392_v29 }
  0x69   : > { %940 = vmatpush.bf16.msra.mxu1 %v2397_v30 }
  0x6a   : > { %1130 = vmatpush.bf16.msrb.mxu2 %v2335_v20 }
  0x6b   : > { %978 = vmatpush.bf16.msra.mxu3 %v2536_v42  ;;  %922 = vmatmul.bf16.vlgmr.msra.gmra.mxu0 %v1854_v56  ;;  %v1890_v56 = vor.u32 %v2128_v33, %v1887_v34  ;;  %v2134_v33 = vld [vmem:[%s2370_s19 + $0xe4] sm:$0xf]  ;;  %v1925_v34 = vld [vmem:[%s2370_s19 + $0xfc] sm:$0xf0] }
  0x6c   : > { %990 = vmatpush.bf16.msrb.mxu0 %v2433_v46  ;;  %941 = vmatmul.bf16.vlgmr.msra.gmra.mxu1 %v1858_v57  ;;  %v1894_v57 = vor.u32 %v2132_v45, %v1893_v44  ;;  %v1874_v45 = vor.u32 %v2126_v61, %v1873_v60  ;;  %v1951_v60 = vld [vmem:[%s2370_s19 + $0x118] sm:$0xf]  ;;  %v2144_v61 = vld [vmem:[%s2370_s19 + $0x130] sm:$0x10] }
  0x6d   : > { %1015 = vmatpush.bf16.msrb.mxu1 %v2419_v40  ;;  %960 = vmatmul.bf16.vlgmr.msra.gmra.mxu2 %v1862_v58  ;;  %v2122_v58 = vld [vmem:[%s2370_s19 + $0x84] sm:$0xf] }
  0x6e   : > { %979 = vmatmul.bf16.vlgmr.msra.gmra.mxu3 %v1866_v59  ;;  %1131 = vmatpush.bf16.msrb.mxu2 %v2360_v24  ;;  %v1867_v59 = vld [vmem:[%s2370_s19 + $0x9c] sm:$0xf0] }
  0x6f   : > { %1144 = vmatpush.bf16.msrb.mxu3 %v2216_v1  ;;  %v1870_v44 = vor.u32 %v2122_v58, %v1867_v59  ;;  %v1901_v58 = vld [vmem:[%s2370_s19 + $0xc0] sm:$0xf]  ;;  %v2133_v59 = vld [vmem:[%s2370_s19 + $0xd8] sm:$0x10] }
  0x70   : > { %991 = vmatpush.bf16.msrb.mxu0 %v2452_v49 }
  0x71   : > { %1016 = vmatpush.bf16.msrb.mxu1 %v2445_v48 }
  0x72   : > { %1132 = vmatpush.bf16.msrb.mxu2 %v2387_v28 }
  0x73   : > { %1145 = vmatpush.bf16.msrb.mxu3 %v2238_v5 }
  0x74   : > { %992 = vmatpush.bf16.msrb.mxu0 %v2467_v51 }
  0x75   : > { %1182 = vmatpush.bf16.msra.mxu1 %v2226_v3 }
  0x76   : > { %1201 = vmatpush.bf16.msra.mxu2 %v2424_v41 }
  0x77   : > { %1146 = vmatpush.bf16.msrb.mxu3 %v2262_v9 }
  0x78   : > { %993 = vmatpush.bf16.msrb.mxu0 %v2478_v53 }
  0x79   : > { %1183 = vmatpush.bf16.msra.mxu1 %v2250_v7 }
  0x7a   : > { %1202 = vmatpush.bf16.msra.mxu2 %v2440_v47 }
  0x7b   : > { %1147 = vmatpush.bf16.msrb.mxu3 %v2286_v13  ;;  %927 = vmatmul.bf16.gmra.mxu0 %v1882_v54  ;;  %v1924_v54 = vor.u32 %v2137_v32, %v1923_v63  ;;  %v2141_v63 = vld [vmem:[%s2370_s19 + $0x11c] sm:$0xf]  ;;  %v1953_v32 = vld [vmem:[%s2370_s19 + $0x134] sm:$0x10] }
  0x7c   : > { %994 = vmatpush.bf16.msrb.mxu0 %v2503_v35  ;;  %946 = vmatmul.bf16.gmra.mxu1 %v1886_v55  ;;  %v1928_v55 = vor.u32 %v2134_v33, %v1925_v34  ;;  %v1902_v33 = vor.u32 %v2133_v59, %v1901_v58  ;;  %v1952_v34 = vor.u32 %v2144_v61, %v1951_v60  ;;  %v2145_v61 = vld [vmem:[%s2370_s19 + $0x138] sm:$0x10] }
  0x7d   : > { %1184 = vmatpush.bf16.msra.mxu1 %v2274_v11  ;;  %965 = vmatmul.bf16.gmra.mxu2 %v1890_v56  ;;  %v2129_v56 = vld [vmem:[%s2370_s19 + $0xbc] sm:$0xf] }
  0x7e   : > { %984 = vmatmul.bf16.gmra.mxu3 %v1894_v57  ;;  %1203 = vmatpush.bf16.msra.mxu2 %v2458_v50  ;;  %v1895_v57 = vld [vmem:[%s2370_s19 + $0xd4] sm:$0x10] }
  0x7f   : > { %1148 = vmatpush.bf16.msrb.mxu3 %v2312_v17 }
  0x80   : > { %995 = vmatpush.bf16.msrb.mxu0 %v2516_v37 }
  0x81   : > { %1185 = vmatpush.bf16.msra.mxu1 %v2300_v15 }
  0x82   : > { %1204 = vmatpush.bf16.msra.mxu2 %v2473_v52 }
  0x83   : > { %1149 = vmatpush.bf16.msrb.mxu3 %v2340_v21 }
  0x84   : > { %996 = vmatpush.bf16.msrb.mxu0 %v2530_v39 }
  0x85   : > { %1186 = vmatpush.bf16.msra.mxu1 %v2328_v19 }
  0x86   : > { %1205 = vmatpush.bf16.msra.mxu2 %v2495_v62 }
  0x87   : > { %1150 = vmatpush.bf16.msrb.mxu3 %v2365_v25 }
  0x88   : > { %997 = vmatpush.bf16.msrb.mxu0 %v2542_v43 }
  0x89   : > { %1187 = vmatpush.bf16.msra.mxu1 %v2353_v23 }
  0x8a   : > { %1206 = vmatpush.bf16.msra.mxu2 %v2509_v36 }
  0x8b   : > { %1151 = vmatpush.bf16.msrb.mxu3 %v2392_v29  ;;  %998 = vmatmul.bf16.vlgmr.msrb.gmra.mxu0 %v1870_v44  ;;  %v1956_v44 = vor.u32 %v2141_v63, %v1953_v32  ;;  %v2142_v63 = vld [vmem:[%s2370_s19 + $0x124] sm:$0xf]  ;;  %v1961_v32 = vld [vmem:[%s2370_s19 + $0x13c] sm:$0x10] }
  0x8c   : > { %1163 = vmatpush.bf16.msra.mxu0 %v2221_v2  ;;  %1903 = vmatmul.msk.bf16.vlgmr.msrb.gmra.mxu1 %vm662_vm0, %v1874_v45  ;;  %v2136_v45 = vld [vmem:[%s2370_s19 + $0xf4] sm:$0xf] }
  0x8d   : > { %1188 = vmatpush.bf16.msra.mxu1 %v2382_v27  ;;  %1133 = vmatmul.bf16.vlgmr.msrb.gmra.mxu2 %v1924_v54  ;;  %v1941_v54 = vld [vmem:[%s2370_s19 + $0x10c] sm:$0xf0] }
  0x8e   : > { %1152 = vmatmul.bf16.vlgmr.msrb.gmra.mxu3 %v1928_v55  ;;  %1207 = vmatpush.bf16.msra.mxu2 %v2522_v38  ;;  %v1944_v59 = vor.u32 %v2136_v45, %v1941_v54  ;;  %v1997_v45 = vld [vmem:[%s2370_s19 + $0x150] sm:$0xf]  ;;  %v2151_v54 = vld [vmem:[%s2370_s19 + $0x168] sm:$0xf0] }
  0x8f   : > { %1220 = vmatpush.bf16.msra.mxu3 %v2433_v46 }
  0x90   : > { %1164 = vmatpush.bf16.msra.mxu0 %v2245_v6 }
  0x91   : > { %1189 = vmatpush.bf16.msra.mxu1 %v2402_v31 }
  0x92   : > { %1208 = vmatpush.bf16.msra.mxu2 %v2536_v42 }
  0x93   : > { %1221 = vmatpush.bf16.msra.mxu3 %v2452_v49 }
  0x94   : > { %1165 = vmatpush.bf16.msra.mxu0 %v2269_v10 }
  0x95   : > { %1351 = vmatpush.bf16.msrb.mxu1 %v2211_v0  ;;  %v1898_v0 = vor.u32 %v2129_v56, %v1895_v57 }
  0x96   : > { %1370 = vmatpush.bf16.msrb.mxu2 %v2216_v1  ;;  %v2697_v1 = vld [vmem:[%s2899_s2] ss:$0 sm:$0xff] }
  0x97   : > { %1222 = vmatpush.bf16.msra.mxu3 %v2467_v51 }
  0x98   : > { %1166 = vmatpush.bf16.msra.mxu0 %v2295_v14 }
  0x99   : > { %1352 = vmatpush.bf16.msrb.mxu1 %v2233_v4  ;;  %v1931_v4 = vld [vmem:[%s2370_s19 + $0xe8] sm:$0xf] }
  0x9a   : > { %1371 = vmatpush.bf16.msrb.mxu2 %v2238_v5  ;;  %v2138_v5 = vld [vmem:[%s2370_s19 + $0x100] sm:$0xf0] }
  0x9b   : > { %1223 = vmatpush.bf16.msra.mxu3 %v2478_v53  ;;  %1003 = vmatmul.bf16.gmra.mxu0 %v1898_v0  ;;  %v1932_v55 = vor.u32 %v2138_v5, %v1931_v4  ;;  %v1967_v0 = vld [vmem:[%s2370_s19 + $0x128] sm:$0xf]  ;;  %v1964_v5 = vor.u32 %v2142_v63, %v1961_v32 }
  0x9c   : > { %1167 = vmatpush.bf16.msra.mxu0 %v2323_v18  ;;  %1904 = vmatmul.msk.bf16.gmra.mxu1 %vm662_vm0, %v1902_v33  ;;  %v2146_v33 = vld [vmem:[%s2370_s19 + $0x140] sm:$0x10] }
  0x9d   : > { %1353 = vmatpush.bf16.msrb.mxu1 %v2257_v8  ;;  %1138 = vmatmul.bf16.gmra.mxu2 %v1952_v34  ;;  %v2135_v8 = vld [vmem:[%s2370_s19 + $0xec] sm:$0xf]  ;;  %v1969_v34 = vld [vmem:[%s2370_s19 + $0x144] sm:$0x10] }
  0x9e   : > { %1157 = vmatmul.bf16.gmra.mxu3 %v1956_v44  ;;  %1372 = vmatpush.bf16.msrb.mxu2 %v2262_v9  ;;  %v1933_v9 = vld [vmem:[%s2370_s19 + $0x104] sm:$0xf0] }
  0x9f   : > { %1224 = vmatpush.bf16.msra.mxu3 %v2503_v35  ;;  %v1936_v57 = vor.u32 %v2135_v8, %v1933_v9  ;;  %v1968_v8 = vor.u32 %v2146_v33, %v1967_v0 }
  0xa0   : > { %1168 = vmatpush.bf16.msra.mxu0 %v2348_v22 }
  0xa1   : > { %1354 = vmatpush.bf16.msrb.mxu1 %v2281_v12  ;;  %v1939_v12 = vld [vmem:[%s2370_s19 + $0xf0] sm:$0xf] }
  0xa2   : > { %1373 = vmatpush.bf16.msrb.mxu2 %v2286_v13  ;;  %v2139_v13 = vld [vmem:[%s2370_s19 + $0x108] sm:$0xf0] }
  0xa3   : > { %1225 = vmatpush.bf16.msra.mxu3 %v2516_v37  ;;  %v1940_v58 = vor.u32 %v2139_v13, %v1939_v12  ;;  %v2140_v13 = vld [vmem:[%s2370_s19 + $0x110] sm:$0xf0] }
  0xa4   : > { %1169 = vmatpush.bf16.msra.mxu0 %v2377_v26 }
  0xa5   : > { %1355 = vmatpush.bf16.msrb.mxu1 %v2307_v16 }
  0xa6   : > { %1374 = vmatpush.bf16.msrb.mxu2 %v2312_v17 }
  0xa7   : > { %1226 = vmatpush.bf16.msra.mxu3 %v2530_v39 }
  0xa8   : > { %1170 = vmatpush.bf16.msra.mxu0 %v2397_v30 }
  0xa9   : > { %v697_v56 = vpop.f32.mrf.mxu1  ;;  %1356 = vmatpush.bf16.msrb.mxu1 %v2335_v20 }
  0xaa   : > { %1375 = vmatpush.bf16.msrb.mxu2 %v2340_v21 }
  0xab   : > { %1227 = vmatpush.bf16.msra.mxu3 %v2542_v43  ;;  %1171 = vmatmul.bf16.vlgmr.msra.gmra.mxu0 %v1932_v55  ;;  %v2148_v55 = vld [vmem:[%s2370_s19 + $0x154] sm:$0xf] }
  0xac   : > { %1245 = vmatpush.bf16.msrb.mxu0 %v2419_v40  ;;  %1190 = vmatmul.bf16.vlgmr.msra.gmra.mxu1 %v1936_v57 }
  0xad   : > { %1209 = vmatmul.bf16.vlgmr.msra.gmra.mxu2 %v1940_v58  ;;  %1357 = vmatpush.bf16.msrb.mxu1 %v2360_v24 }
  0xae   : > { %1228 = vmatmul.bf16.vlgmr.msra.gmra.mxu3 %v1944_v59  ;;  %1376 = vmatpush.bf16.msrb.mxu2 %v2365_v25 }
  0xaf   : > { %1389 = vmatpush.bf16.msrb.mxu3 %v2221_v2  ;;  %v678_v2 = vpop.f32.mrf.mxu0 }
  0xb0   : > { %1246 = vmatpush.bf16.msrb.mxu0 %v2445_v48  ;;  %v679_v16 = vadd.f32 %v2697_v1, %v678_v2  ;;  %v1999_v2 = vld [vmem:[%s2370_s19 + $0x16c] sm:$0xf0] }
  0xb1   : > { %v735_v17 = vpop.f32.mrf.mxu3  ;;  %v699_v21 = vpop.f32.mrf.mxu1  ;;  %1358 = vmatpush.bf16.msrb.mxu1 %v2387_v28  ;;  %v2002_v59 = vor.u32 %v2148_v55, %v1999_v2 }
  0xb2   : > { %v698_v60 = vadd.f32 %v697_v56, %v679_v16  ;;  %1377 = vmatpush.bf16.msrb.mxu2 %v2392_v29  ;;  %v2143_v29 = vld [vmem:[%s2370_s19 + $0x12c] sm:$0xf]  ;;  %v2152_v56 = vld [vmem:[%s2370_s19 + $0x170] sm:$0xf0]  ;;  %v1998_v16 = vor.u32 %v2151_v54, %v1997_v45 }
  0xb3   : > { %1390 = vmatpush.bf16.msrb.mxu3 %v2245_v6  ;;  %v716_v6 = vpop.f32.mrf.mxu2  ;;  %v1972_v9 = vor.u32 %v2143_v29, %v1969_v34 }
  0xb4   : > { %1408 = vmatpush.bf16.msra.mxu0 %v2226_v3  ;;  %v717_v20 = vadd.f32 %v716_v6, %v698_v60 }
  0xb5   : > { %1427 = vmatpush.bf16.msra.mxu1 %v2424_v41 }
  0xb6   : > { %v2723_v24 = vadd.f32 %v735_v17, %v717_v20  ;;  %1446 = vmatpush.bf16.msra.mxu2 %v2433_v46 }
  0xb7   : > { %1391 = vmatpush.bf16.msrb.mxu3 %v2269_v10  ;;  %v680_v10 = vpop.f32.mrf.mxu0 }
  0xb8   : > { %v681_v25 = vadd.f32 %v2697_v1, %v680_v10  ;;  %1409 = vmatpush.bf16.msra.mxu0 %v2250_v7 }
  0xb9   : > { %v737_v44 = vpop.f32.mrf.mxu3  ;;  %1428 = vmatpush.bf16.msra.mxu1 %v2440_v47  ;;  %v702_v4 = vpop.f32.mrf.mxu1 }
  0xba   : > { %v700_v3 = vadd.f32 %v699_v21, %v681_v25  ;;  %1447 = vmatpush.bf16.msra.mxu2 %v2452_v49  ;;  %v1975_v21 = vld [vmem:[%s2370_s19 + $0x130] sm:$0xf]  ;;  %v2147_v25 = vld [vmem:[%s2370_s19 + $0x148] sm:$0x10] }
  0xbb   : > { %1392 = vmatpush.bf16.msrb.mxu3 %v2295_v14  ;;  %v1959_v14 = vld [vmem:[%s2370_s19 + $0x120] sm:$0xf]  ;;  %v718_v28 = vpop.f32.mrf.mxu2  ;;  %v1976_v63 = vor.u32 %v2147_v25, %v1975_v21  ;;  %v2161_v21 = vld [vmem:[%s2370_s19 + $0x1b8] sm:$0x10] }
  0xbc   : > { %v1960_v46 = vor.u32 %v2145_v61, %v1959_v14  ;;  %1410 = vmatpush.bf16.msra.mxu0 %v2274_v11  ;;  %1195 = vmatmul.bf16.gmra.mxu1 %v1964_v5  ;;  %v2033_v14 = vld [vmem:[%s2370_s19 + $0x190] sm:$0xf]  ;;  %v2159_v61 = vld [vmem:[%s2370_s19 + $0x1a8] sm:$0x10] }
  0xbd   : > { %1214 = vmatmul.bf16.gmra.mxu2 %v1968_v8  ;;  %1429 = vmatpush.bf16.msra.mxu1 %v2458_v50 }
  0xbe   : > { %1448 = vmatpush.bf16.msra.mxu2 %v2467_v51  ;;  %1176 = vmatmul.bf16.gmra.mxu0 %v1960_v46 }
  0xbf   : > { %1393 = vmatpush.bf16.msrb.mxu3 %v2323_v18  ;;  %v719_v18 = vadd.f32 %v718_v28, %v700_v3  ;;  %v683_v41 = vpop.f32.mrf.mxu0  ;;  %v2155_v3 = vld [vmem:[%s2370_s19 + $0x18c] sm:$0xf] }
  0xc0   : > { %v684_v7 = vadd.f32 %v2697_v1, %v683_v41  ;;  %1233 = vmatmul.bf16.gmra.mxu3 %v1972_v9  ;;  %1411 = vmatpush.bf16.msra.mxu0 %v2300_v15 }
  0xc1   : > { %v738_v12 = vadd.f32 %v737_v44, %v719_v18  ;;  %v704_v51 = vpop.f32.mrf.mxu1  ;;  %1430 = vmatpush.bf16.msra.mxu1 %v2473_v52  ;;  %v2034_v44 = vor.u32 %v2159_v61, %v2033_v14 }
  0xc2   : > { %v703_v49 = vadd.f32 %v702_v4, %v684_v7  ;;  %1449 = vmatpush.bf16.msra.mxu2 %v2478_v53 }
  0xc3   : > { %1394 = vmatpush.bf16.msrb.mxu3 %v2348_v22  ;;  %v721_v11 = vpop.f32.mrf.mxu2  ;;  %v740_v22 = vpop.f32.mrf.mxu3 }
  0xc4   : > { %v722_v47 = vadd.f32 %v721_v11, %v703_v49  ;;  %1412 = vmatpush.bf16.msra.mxu0 %v2328_v19  ;;  %v2007_v49 = vld [vmem:[%s2370_s19 + $0x174] sm:$0xf0]  ;;  %v2013_v11 = vld [vmem:[%s2370_s19 + $0x160] sm:$0xf] }
  0xc5   : > { %1431 = vmatpush.bf16.msra.mxu1 %v2495_v62 }
  0xc6   : > { %v741_v15 = vadd.f32 %v740_v22, %v722_v47  ;;  %1450 = vmatpush.bf16.msra.mxu2 %v2503_v35  ;;  %v2153_v22 = vld [vmem:[%s2370_s19 + $0x178] sm:$0xf0]  ;;  %v2150_v47 = vld [vmem:[%s2370_s19 + $0x164] sm:$0xf] }
  0xc7   : > { %1395 = vmatpush.bf16.msrb.mxu3 %v2377_v26  ;;  %v685_v26 = vpop.f32.mrf.mxu0  ;;  %v2014_v55 = vor.u32 %v2153_v22, %v2013_v11 }
  0xc8   : > { %v686_v50 = vadd.f32 %v2697_v1, %v685_v26  ;;  %1413 = vmatpush.bf16.msra.mxu0 %v2353_v23  ;;  %v2015_v26 = vld [vmem:[%s2370_s19 + $0x17c] sm:$0xf0] }
  0xc9   : > { %v773_v60 = vpop.f32.mrf.mxu1  ;;  %1432 = vmatpush.bf16.msra.mxu1 %v2509_v36  ;;  %v2018_v2 = vor.u32 %v2150_v47, %v2015_v26 }
  0xca   : > { %v705_v53 = vadd.f32 %v704_v51, %v686_v50  ;;  %1451 = vmatpush.bf16.msra.mxu2 %v2516_v37  ;;  %v2021_v51 = vld [vmem:[%s2370_s19 + $0x168] sm:$0xf]  ;;  %v2154_v50 = vld [vmem:[%s2370_s19 + $0x180] sm:$0xf0] }
  0xcb   : > { %1396 = vmatpush.bf16.msrb.mxu3 %v2397_v30  ;;  %v1947_v30 = vld [vmem:[%s2370_s19 + $0xf8] sm:$0xf]  ;;  %v723_v52 = vpop.f32.mrf.mxu2  ;;  %v742_v35 = vpop.f32.mrf.mxu3 }
  0xcc   : > { %v1948_v19 = vor.u32 %v2140_v13, %v1947_v30  ;;  %v724_v57 = vadd.f32 %v723_v52, %v705_v53  ;;  %1414 = vmatpush.bf16.msra.mxu0 %v2382_v27  ;;  %1359 = vmatmul.bf16.vlgmr.msrb.gmra.mxu1 %v1998_v16  ;;  %v2022_v52 = vor.u32 %v2154_v50, %v2021_v51 }
  0xcd   : > { %1378 = vmatmul.bf16.vlgmr.msrb.gmra.mxu2 %v2002_v59  ;;  %1433 = vmatpush.bf16.msra.mxu1 %v2522_v38  ;;  %v2025_v38 = vld [vmem:[%s2370_s19 + $0x188] sm:$0xf] }
  0xce   : > { %v743_v62 = vadd.f32 %v742_v35, %v724_v57  ;;  %1452 = vmatpush.bf16.msra.mxu2 %v2530_v39  ;;  %1977 = vmatmul.msk.bf16.vlgmr.msrb.gmra.mxu0 %vm662_vm0, %v1948_v19 }
  0xcf   : > { %1471 = vmatpush.bf16.msra.mxu3 %v2419_v40  ;;  %v2005_v40 = vld [vmem:[%s2370_s19 + $0x158] sm:$0xf]  ;;  %v754_v58 = vpop.f32.mrf.mxu0 }
  0xd0   : > { %v2006_v6 = vor.u32 %v2152_v56, %v2005_v40  ;;  %1415 = vmatpush.bf16.msra.mxu0 %v2402_v31 }
  0xd1   : > { %v775_v20 = vpop.f32.mrf.mxu1  ;;  %1434 = vmatpush.bf16.msra.mxu1 %v2536_v42 }
  0xd2   : > { %1397 = vmatmul.bf16.vlgmr.msrb.gmra.mxu3 %v2006_v6  ;;  %1453 = vmatpush.bf16.msra.mxu2 %v2542_v43  ;;  %v2027_v43 = vld [vmem:[%s2370_s19 + $0x1a4] sm:$0x10] }
  0xd3   : > { %1472 = vmatpush.bf16.msra.mxu3 %v2445_v48  ;;  %v755_v48 = vadd.f32 %v754_v58, %v2723_v24  ;;  %v792_v23 = vpop.f32.mrf.mxu2  ;;  %v904_v36 = vpop.f32.mrf.mxu3  ;;  %v2158_v24 = vld [vmem:[%s2370_s19 + $0x1a0] sm:$0x10]  ;;  %v2030_v34 = vor.u32 %v2155_v3, %v2027_v43 }
  0xd4   : > { %v2026_v29 = vor.u32 %v2158_v24, %v2025_v38 }
  0xd5   : > { %v774_v37 = vadd.f32 %v773_v60, %v755_v48 }
  0xd7   : > { %v2774_v27 = vadd.f32 %v792_v23, %v774_v37  ;;  %v756_v39 = vpop.f32.mrf.mxu0  ;;  %v2156_v37 = vld [vmem:[%s2370_s19 + $0x194] sm:$0xf]  ;;  %v2035_v23 = vld [vmem:[%s2370_s19 + $0x1ac] sm:$0x10] }
  0xd8   : > { %v757_v17 = vadd.f32 %v756_v39, %v738_v12  ;;  %v2149_v12 = vld [vmem:[%s2370_s19 + $0x15c] sm:$0xf]  ;;  %v2160_v39 = vld [vmem:[%s2370_s19 + $0x1b0] sm:$0x10]  ;;  %v2038_v24 = vor.u32 %v2156_v37, %v2035_v23 }
  0xd9   : > { %v778_v42 = vpop.f32.mrf.mxu1  ;;  %v2010_v30 = vor.u32 %v2149_v12, %v2007_v49 }
  0xda   : > { %v776_v10 = vadd.f32 %v775_v20, %v757_v17  ;;  %v2157_v17 = vld [vmem:[%s2370_s19 + $0x19c] sm:$0xf]  ;;  %v2043_v20 = vld [vmem:[%s2370_s19 + $0x1b4] sm:$0x10] }
  0xdb   : > { %v794_v31 = vpop.f32.mrf.mxu2  ;;  %v906_v0 = vpop.f32.mrf.mxu3 }
  0xdc   : > { %v2785_v32 = vadd.f32 %v794_v31, %v776_v10  ;;  %1364 = vmatmul.bf16.gmra.mxu1 %v2026_v29  ;;  %v907_v19 = vadd.f32 %v2697_v1, %v906_v0  ;;  %v2049_v10 = vld [vmem:[%s2370_s19 + $0x1a0] sm:$0xf]  ;;  %v2046_v31 = vor.u32 %v2157_v17, %v2043_v20 }
  0xdd   : > { %1383 = vmatmul.bf16.gmra.mxu2 %v2030_v34 }
  0xde   : > { %1978 = vmatmul.msk.bf16.gmra.mxu0 %vm662_vm0, %v1976_v63 }
  0xdf   : > { %v759_v33 = vpop.f32.mrf.mxu0 }
  0xe0   : > { %v760_v28 = vadd.f32 %v759_v33, %v741_v15  ;;  %v905_v15 = vadd.f32 %v2697_v1, %v904_v36  ;;  %v2041_v36 = vld [vmem:[%s2370_s19 + $0x198] sm:$0xf]  ;;  %v2050_v33 = vor.u32 %v2161_v21, %v2049_v10  ;;  %s2055_s19 = sshll.u32 %s2903_s13, 4 }
  0xe1   : > { %v780_v7 = vpop.f32.mrf.mxu1  ;;  %v2042_v61 = vor.u32 %v2160_v39, %v2041_v36  ;;  %s2865_s24 = scalar_lea.vmem %s2900_s3, %s2055_s19 }
  0xe2   : > { %v779_v46 = vadd.f32 %v778_v42, %v760_v28  ;;  %1402 = vmatmul.bf16.gmra.mxu3 %v2034_v44 }
  0xe3   : > { %v797_v18 = vpop.f32.mrf.mxu2  ;;  %v909_v4 = vpop.f32.mrf.mxu3 }
  0xe4   : > { %v2788_v41 = vadd.f32 %v797_v18, %v779_v46  ;;  %v910_v25 = vadd.f32 %v2697_v1, %v909_v4 }
  0xe7   : > { %v761_v5 = vpop.f32.mrf.mxu0 }
  0xe8   : > { %v762_v8 = vadd.f32 %v761_v5, %v743_v62 }
  0xe9   : > { %v942_v56 = vpop.f32.mrf.mxu1 }
  0xea   : > { %v781_v9 = vadd.f32 %v780_v7, %v762_v8 }
  0xeb   : > { %v799_v53 = vpop.f32.mrf.mxu2  ;;  %v911_v45 = vpop.f32.mrf.mxu3 }
  0xec   : > { %v2799_v13 = vadd.f32 %v799_v53, %v781_v9  ;;  %1435 = vmatmul.bf16.vlgmr.msra.gmra.mxu1 %v2014_v55  ;;  %v912_v28 = vadd.f32 %v2697_v1, %v911_v45 }
  0xed   : > { %1454 = vmatmul.bf16.vlgmr.msra.gmra.mxu2 %v2018_v2 }
  0xee   : > { %1416 = vmatmul.bf16.vlgmr.msra.gmra.mxu0 %v2010_v30 }
  0xef   : > { %v923_v54 = vpop.f32.mrf.mxu0 }
  0xf0   : > { %v924_v40 = vadd.f32 %v923_v54, %v905_v15 }
  0xf1   : > { %v944_v60 = vpop.f32.mrf.mxu1 }
  0xf2   : > { %v943_v35 = vadd.f32 %v942_v56, %v924_v40  ;;  %2051 = vmatmul.msk.bf16.vlgmr.msra.gmra.mxu3 %vm662_vm0, %v2022_v52 }
  0xf3   : > { %v961_v57 = vpop.f32.mrf.mxu2  ;;  %v980_v16 = vpop.f32.mrf.mxu3 }
  0xf4   : > { %v962_v58 = vadd.f32 %v961_v57, %v943_v35 }
  0xf6   : > { %v981_v6 = vadd.f32 %v980_v16, %v962_v58 }
  0xf7   : > { %v925_v59 = vpop.f32.mrf.mxu0 }
  0xf8   : > { %v926_v48 = vadd.f32 %v925_v59, %v907_v19 }
  0xf9   : > { %v947_v0 = vpop.f32.mrf.mxu1 }
  0xfa   : > { %v945_v62 = vadd.f32 %v944_v60, %v926_v48 }
  0xfb   : > { %v963_v38 = vpop.f32.mrf.mxu2  ;;  %v982_v43 = vpop.f32.mrf.mxu3 }
  0xfc   : > { %v964_v3 = vadd.f32 %v963_v38, %v945_v62  ;;  %1440 = vmatmul.bf16.gmra.mxu1 %v2042_v61 }
  0xfd   : > { %1459 = vmatmul.bf16.gmra.mxu2 %v2046_v31 }
  0xfe   : > { %v983_v29 = vadd.f32 %v982_v43, %v964_v3  ;;  %1421 = vmatmul.bf16.gmra.mxu0 %v2038_v24 }
  0xff   : > { %v928_v14 = vpop.f32.mrf.mxu0 }
 0x100   : > { %v929_v63 = vadd.f32 %v928_v14, %v910_v25 }
 0x101   : > { %v949_v5 = vpop.f32.mrf.mxu1 }
 0x102   : > { %v948_v34 = vadd.f32 %v947_v0, %v929_v63  ;;  %2052 = vmatmul.msk.bf16.gmra.mxu3 %vm662_vm0, %v2050_v33 }
 0x103   : > { %v966_v42 = vpop.f32.mrf.mxu2  ;;  %v985_v46 = vpop.f32.mrf.mxu3 }
 0x104   : > { %v967_v44 = vadd.f32 %v966_v42, %v948_v34 }
 0x106   : > { %v986_v8 = vadd.f32 %v985_v46, %v967_v44 }
 0x107   : > { %v930_v18 = vpop.f32.mrf.mxu0 }
 0x108   : > { %v931_v4 = vadd.f32 %v930_v18, %v912_v28 }
 0x109   : > { %v1018_v47 = vpop.f32.mrf.mxu1 }
 0x10a   : > { %v950_v7 = vadd.f32 %v949_v5, %v931_v4 }
 0x10b   : > { %v968_v9 = vpop.f32.mrf.mxu2  ;;  %v987_v49 = vpop.f32.mrf.mxu3 }
 0x10c   : > { %v969_v12 = vadd.f32 %v968_v9, %v950_v7 }
 0x10e   : > { %v988_v26 = vadd.f32 %v987_v49, %v969_v12 }
 0x10f   : > { %v999_v11 = vpop.f32.mrf.mxu0 }
 0x110   : > { %v1000_v22 = vadd.f32 %v999_v11, %v981_v6 }
 0x111   : > { %v1020_v55 = vpop.f32.mrf.mxu1 }
 0x112   : > { %v2814_v51 = vadd.f32 %v1018_v47, %v1000_v22 }
 0x113   : > { %v1134_v15 = vpop.f32.mrf.mxu2  ;;  %v1153_v30 = vpop.f32.mrf.mxu3 }
 0x114   : > { %v1028_v50 = vmax.f32 %v2774_v27, %v2814_v51  ;;  %v1135_v53 = vadd.f32 %v2697_v1, %v1134_v15 }
 0x116   : > { %v1154_v2 = vadd.f32 %v1153_v30, %v1135_v53 }
 0x117   : > { %v1001_v45 = vpop.f32.mrf.mxu0 }
 0x118   : > { %v1002_v54 = vadd.f32 %v1001_v45, %v983_v29 }
 0x119   : > { %v1023_v16 = vpop.f32.mrf.mxu1 }
 0x11a   : > { %v2819_v40 = vadd.f32 %v1020_v55, %v1002_v54 }
 0x11b   : > { %v1136_v52 = vpop.f32.mrf.mxu2  ;;  %v1155_v19 = vpop.f32.mrf.mxu3 }
 0x11c   : > { %v1029_v56 = vmax.f32 %v2785_v32, %v2819_v40  ;;  %v1137_v35 = vadd.f32 %v2697_v1, %v1136_v52 }
 0x11e   : > { %v1156_v59 = vadd.f32 %v1155_v19, %v1137_v35 }
 0x11f   : > { %v1004_v57 = vpop.f32.mrf.mxu0 }
 0x120   : > { %v1005_v58 = vadd.f32 %v1004_v57, %v986_v8 }
 0x121   : > { %v1025_v39 = vpop.f32.mrf.mxu1 }
 0x122   : > { %v2824_v48 = vadd.f32 %v1023_v16, %v1005_v58 }
 0x123   : > { %v1139_v6 = vpop.f32.mrf.mxu2  ;;  %v1158_v37 = vpop.f32.mrf.mxu3 }
 0x124   : > { %v1030_v60 = vmax.f32 %v2788_v41, %v2824_v48  ;;  %v1140_v62 = vadd.f32 %v2697_v1, %v1139_v6 }
 0x126   : > { %v2829_v17 = vadd.f32 %v1158_v37, %v1140_v62 }
 0x127   : > { %v1006_v23 = vpop.f32.mrf.mxu0 }
 0x128   : > { %v1007_v36 = vadd.f32 %v1006_v23, %v988_v26 }
 0x129   : > { %v1191_v3 = vpop.f32.mrf.mxu1 }
 0x12a   : > { %v2831_v20 = vadd.f32 %v1025_v39, %v1007_v36 }
 0x12b   : > { %v1141_v21 = vpop.f32.mrf.mxu2  ;;  %v1160_v38 = vpop.f32.mrf.mxu3 }
 0x12c   : > { %v1142_v25 = vadd.f32 %v2697_v1, %v1141_v21  ;;  %v2901_v41 = vmax.f32 %v2799_v13, %v2831_v20 }
 0x12e   : > { %v2836_v43 = vadd.f32 %v1160_v38, %v1142_v25 }
 0x12f   : > { %v1172_v24 = vpop.f32.mrf.mxu0 }
 0x130   : > { %v1173_v52 = vadd.f32 %v1172_v24, %v1154_v2 }
 0x131   : > { %v1193_v63 = vpop.f32.mrf.mxu1 }
 0x132   : > { %v1192_v6 = vadd.f32 %v1191_v3, %v1173_v52 }
 0x133   : > { %v1210_v14 = vpop.f32.mrf.mxu2  ;;  %v1229_v61 = vpop.f32.mrf.mxu3 }
 0x134   : > { %v1211_v23 = vadd.f32 %v1210_v14, %v1192_v6 }
 0x136   : > { %v1230_v38 = vadd.f32 %v1229_v61, %v1211_v23 }
 0x137   : > { %v1174_v31 = vpop.f32.mrf.mxu0 }
 0x138   : > { %v1175_v39 = vadd.f32 %v1174_v31, %v1156_v59 }
 0x139   : > { %v1196_v34 = vpop.f32.mrf.mxu1 }
 0x13b   : > { %v1212_v0 = vpop.f32.mrf.mxu2  ;;  %v1231_v33 = vpop.f32.mrf.mxu3 }
 0x13f   : > { %v1177_v29 = vpop.f32.mrf.mxu0 }
 0x140   : > { %v1178_v59 = vadd.f32 %v1177_v29, %v2829_v17 }
 0x141   : > { %v2844_v46 = vpop.f32.mrf.mxu1 }
 0x142   : > { %v1197_v6 = vadd.f32 %v1196_v34, %v1178_v59 }
 0x143   : > { %v2838_v28 = vpop.f32.mrf.mxu2  ;;  %v2840_v42 = vpop.f32.mrf.mxu3 }
 0x147   : > { %v2842_v44 = vpop.f32.mrf.mxu0 }
 0x148   : > { %v1180_v34 = vadd.f32 %v2842_v44, %v2836_v43 }
 0x149   : > { %v1360_v8 = vpop.f32.mrf.mxu1 }
 0x14a   : > { %v1361_v53 = vadd.f32 %v2697_v1, %v1360_v8 }
 0x14b   : > { %v2846_v18 = vpop.f32.mrf.mxu2  ;;  %v2848_v4 = vpop.f32.mrf.mxu3 }
 0x14f   : > { %v1248_v5 = vpop.f32.mrf.mxu0 }
 0x150   : > { %v1249_v10 = vadd.f32 %v1248_v5, %v1230_v38 }
 0x151   : > { %v1362_v49 = vpop.f32.mrf.mxu1 }
 0x152   : > { %v1363_v62 = vadd.f32 %v2697_v1, %v1362_v49 }
 0x153   : > { %v1379_v7 = vpop.f32.mrf.mxu2 }
 0x154   : > { %v1380_v55 = vadd.f32 %v1379_v7, %v1361_v53  ;;  %v1194_v53 = vadd.f32 %v1193_v63, %v1175_v39 }
 0x155   : > { %v1398_v9 = vpop.f32.mrf.mxu3 }
 0x156   : > { %v1399_v19 = vadd.f32 %v1398_v9, %v1380_v55  ;;  %v1213_v49 = vadd.f32 %v1212_v0, %v1194_v53  ;;  %v1216_v0 = vadd.f32 %v2838_v28, %v1197_v6 }
 0x157   : > { %v1250_v12 = vpop.f32.mrf.mxu0 }
 0x159   : > { %v1365_v26 = vpop.f32.mrf.mxu1 }
 0x15a   : > { %v1366_v7 = vadd.f32 %v2697_v1, %v1365_v26 }
 0x15b   : > { %v1381_v11 = vpop.f32.mrf.mxu2 }
 0x15c   : > { %v1382_v36 = vadd.f32 %v1381_v11, %v1363_v62  ;;  %v1232_v11 = vadd.f32 %v1231_v33, %v1213_v49 }
 0x15d   : > { %v1400_v22 = vpop.f32.mrf.mxu3 }
 0x15e   : > { %v1401_v8 = vadd.f32 %v1400_v22, %v1382_v36  ;;  %v1251_v62 = vadd.f32 %v1250_v12, %v1232_v11  ;;  %v1199_v36 = vadd.f32 %v2844_v46, %v1180_v34 }
 0x15f   : > { %v2850_v47 = vpop.f32.mrf.mxu0 }
 0x160   : > { %v1218_v32 = vadd.f32 %v2846_v18, %v1199_v36 }
 0x161   : > { %v1367_v54 = vpop.f32.mrf.mxu1 }
 0x162   : > { %v1368_v27 = vadd.f32 %v2697_v1, %v1367_v54  ;;  %v1237_v46 = vadd.f32 %v2848_v4, %v1218_v32  ;;  %v1507_v4 = vld [vmem:[%s2865_s24 + $0xc] sm:$0x1] }
 0x163   : > { %v1384_v15 = vpop.f32.mrf.mxu2 }
 0x165   : > { %v1403_v30 = vpop.f32.mrf.mxu3 }
 0x167   : > { %v2853_v45 = vpop.f32.mrf.mxu0 }
 0x169   : > { %v1436_v16 = vpop.f32.mrf.mxu1 }
 0x16b   : > { %v1386_v35 = vpop.f32.mrf.mxu2 }
 0x16c   : > { %v1387_v33 = vadd.f32 %v1386_v35, %v1368_v27 }
 0x16d   : > { %v1405_v57 = vpop.f32.mrf.mxu3 }
 0x16e   : > { %v1406_v54 = vadd.f32 %v1405_v57, %v1387_v33 }
 0x16f   : > { %v1417_v58 = vpop.f32.mrf.mxu0 }
 0x170   : > { %v1418_v37 = vadd.f32 %v1417_v58, %v1399_v19  ;;  %v1385_v19 = vadd.f32 %v1384_v15, %v1366_v7  ;;  %v1256_v7 = vadd.f32 %v2853_v45, %v1237_v46 }
 0x171   : > { %v1438_v55 = vpop.f32.mrf.mxu1 }
 0x172   : > { %v1437_v21 = vadd.f32 %v1436_v16, %v1418_v37  ;;  %v1404_v26 = vadd.f32 %v1403_v30, %v1385_v19  ;;  %v1235_v30 = vadd.f32 %v2840_v42, %v1216_v0 }
 0x173   : > { %v1455_v25 = vpop.f32.mrf.mxu2 }
 0x174   : > { %v1456_v2 = vadd.f32 %v1455_v25, %v1437_v21  ;;  %v1254_v39 = vadd.f32 %v2850_v47, %v1235_v30 }
 0x175   : > { %v1474_v24 = vpop.f32.mrf.mxu3 }
 0x176   : > { %v1475_v3 = vadd.f32 %v1474_v24, %v1456_v2 }
 0x177   : > { %v1419_v9 = vpop.f32.mrf.mxu0 }
 0x178   : > { %v1420_v52 = vadd.f32 %v1419_v9, %v1401_v8  ;;  %v1484_v14 = vmax.f32 %v1249_v10, %v1475_v3 }
 0x179   : > { %v1441_v10 = vpop.f32.mrf.mxu1 }
 0x17a   : > { %v1488_v61 = vmax.f32 %v1028_v50, %v1484_v14  ;;  %v1439_v31 = vadd.f32 %v1438_v55, %v1420_v52 }
 0x17b   : > { %v1457_v22 = vpop.f32.mrf.mxu2 }
 0x17c   : > { %v1492_v58 = vmax.f32 %v1488_v61, 0.0  ;;  %v1458_v63 = vadd.f32 %v1457_v22, %v1439_v31 }
 0x17d   : > { %v1476_v16 = vpop.f32.mrf.mxu3 }
 0x17e   : > { %v1496_v51 = vpack.c.bf16 %v1492_v58, %v1492_v58  ;;  %v1477_v50 = vadd.f32 %v1476_v16, %v1458_v63 }
 0x17f   : > { %v1422_v5 = vpop.f32.mrf.mxu0 }
 0x180   : > { %v1423_v17 = vadd.f32 %v1422_v5, %v1404_v26  ;;  %1501 = vst.msk [vmem:[%s2865_s24] sm:$0xf] %vm1500_vm1, %v1496_v51  ;;  %v1485_v29 = vmax.f32 %v1251_v62, %v1477_v50 }
 0x182   : > { %v1489_v12 = vmax.f32 %v1029_v56, %v1485_v29  ;;  %v1442_v15 = vadd.f32 %v1441_v10, %v1423_v17  ;;  %v1443_v56 = vpop.f32.mrf.mxu1 }
 0x183   : > { %v1460_v1 = vpop.f32.mrf.mxu2 }
 0x184   : > { %v1493_v37 = vmax.f32 %v1489_v12, 0.0  ;;  %v1461_v23 = vadd.f32 %v1460_v1, %v1442_v15 }
 0x185   : > { %v1479_v28 = vpop.f32.mrf.mxu3 }
 0x186   : > { %v1497_v21 = vpack.c.bf16 %v1493_v37, %v1493_v37  ;;  %v1480_v43 = vadd.f32 %v1479_v28, %v1461_v23 }
 0x187   : > { %v1424_v35 = vpop.f32.mrf.mxu0 }
 0x188   : > { %v1425_v44 = vadd.f32 %v1424_v35, %v1406_v54  ;;  %1502 = vst.msk [vmem:[%s2865_s24 + $0x4] sm:$0xf] %vm1500_vm1, %v1497_v21  ;;  %v1486_v40 = vmax.f32 %v1254_v39, %v1480_v43 }
 0x18a   : > { %v1490_v42 = vmax.f32 %v1030_v60, %v1486_v40  ;;  %v1444_v57 = vadd.f32 %v1443_v56, %v1425_v44 }
 0x18b   : > { %v1462_v25 = vpop.f32.mrf.mxu2 }
 0x18c   : > { %v1494_v47 = vmax.f32 %v1490_v42, 0.0  ;;  %v1463_v38 = vadd.f32 %v1462_v25, %v1444_v57 }
 0x18d   : > { %v1481_v8 = vpop.f32.mrf.mxu3 }
 0x18e   : > { %v1498_v18 = vpack.c.bf16 %v1494_v47, %v1494_v47  ;;  %v1482_v2 = vadd.f32 %v1481_v8, %v1463_v38 }
 0x190   : > { %1503 = vst.msk [vmem:[%s2865_s24 + $0x8] sm:$0xf] %vm1500_vm1, %v1498_v18  ;;  %v1487_v24 = vmax.f32 %v1256_v7, %v1482_v2 }
 0x192   : > { %v1491_v48 = vmax.f32 %v2901_v41, %v1487_v24 }
 0x194   : > { %v1495_v60 = vmax.f32 %v1491_v48, 0.0 }
 0x196   : > { %v1499_v9 = vpack.c.bf16 %v1495_v60, %v1495_v60 }
 0x198   : > { %v1508_v53 = vsel %vm1506_vm4, %v1499_v9, %v1507_v4 }
 0x199   : > { %1509 = vst [vmem:[%s2865_s24 + $0xc] sm:$0x1] %v1508_v53 }
 0x19a PF: > { %s13_s12 = sadd.s32 1, %s2178_s12  }
 0x19b   : > { %p10_p4 = scmp.ge.s32.totalorder %s13_s12, 4  }
 0x19d   :  { %12 = sbr.rel (!%p10_p4) target bundleno = 1 (0x1), region = 65 }

// kernel: cnn_forward.5
= control target key start
LH: loop header
LB: loop body
LE: loop exit
PB: predicated region body
PF: predicated region fallthrough
CT: control target
= control target key end

     0   :  { %s2226_s0 = inlined_call_operand.vmem [shape: bf16[2,1600], index: 0, kind: input, shape index: {}]   ;;  %s2227_s1 = inlined_call_operand.vmem [shape: bf16[1600,120], index: 1, kind: input, shape index: {}]   ;;  %s2228_s2 = inlined_call_operand.vmem [shape: f32[1,120], index: 2, kind: input, shape index: {}]   ;;  %s2229_s3 = inlined_call_operand.vmem [shape: bf16[120,84], index: 3, kind: input, shape index: {}]   ;;  %s2230_s4 = inlined_call_operand.vmem [shape: f32[1,84], index: 4, kind: input, shape index: {}]   ;;  %s2231_s5 = inlined_call_operand.vmem [shape: bf16[84,10], index: 5, kind: input, shape index: {}]   ;;  %s2232_s6 = inlined_call_operand.vmem [shape: f32[1,10], index: 6, kind: input, shape index: {}]   ;;  %s2233_s7 = inlined_call_operand.hbm [shape: f32[2,10], index: 7, kind: output, shape index: {}]  }
   0x1   :  { %v1680_v0 = vld [vmem:[%s2227_s1 + $0x38] sm:$0xff]  ;;  %v1679_v4 = vld [vmem:[%s2227_s1 + $0x30] sm:$0xff]  ;;  %v1678_v8 = vld [vmem:[%s2227_s1 + $0x28] sm:$0xff] }
   0x2   :  { %v1696_v1 = vld [vmem:[%s2227_s1 + $0xb8] sm:$0xff]  ;;  %866 = vmatpush.bf16.msra.mxu0 %v1680_v0  ;;  %v1695_v5 = vld [vmem:[%s2227_s1 + $0xb0] sm:$0xff]  ;;  %v1694_v9 = vld [vmem:[%s2227_s1 + $0xa8] sm:$0xff] }
   0x3   :  { %v1704_v2 = vld [vmem:[%s2227_s1 + $0xf8] sm:$0xff]  ;;  %892 = vmatpush.bf16.msra.mxu2 %v1696_v1  ;;  %v1703_v6 = vld [vmem:[%s2227_s1 + $0xf0] sm:$0xff]  ;;  %v1702_v10 = vld [vmem:[%s2227_s1 + $0xe8] sm:$0xff] }
   0x4   :  { %v1688_v3 = vld [vmem:[%s2227_s1 + $0x78] sm:$0xff]  ;;  %905 = vmatpush.bf16.msra.mxu3 %v1704_v2  ;;  %v1687_v7 = vld [vmem:[%s2227_s1 + $0x70] sm:$0xff]  ;;  %v1686_v11 = vld [vmem:[%s2227_s1 + $0x68] sm:$0xff] }
   0x5   :  { %879 = vmatpush.bf16.msra.mxu1 %v1688_v3  ;;  %v1677_v12 = vld [vmem:[%s2227_s1 + $0x20] sm:$0xff]  ;;  %v1676_v16 = vld [vmem:[%s2227_s1 + $0x18] sm:$0xff]  ;;  %v1675_v20 = vld [vmem:[%s2227_s1 + $0x10] sm:$0xff] }
   0x6   :  { %867 = vmatpush.bf16.msra.mxu0 %v1679_v4  ;;  %v1693_v13 = vld [vmem:[%s2227_s1 + $0xa0] sm:$0xff]  ;;  %v1692_v17 = vld [vmem:[%s2227_s1 + $0x98] sm:$0xff]  ;;  %v1691_v22 = vld [vmem:[%s2227_s1 + $0x90] sm:$0xff] }
   0x7   :  { %893 = vmatpush.bf16.msra.mxu2 %v1695_v5  ;;  %v1701_v14 = vld [vmem:[%s2227_s1 + $0xe0] sm:$0xff]  ;;  %v1700_v18 = vld [vmem:[%s2227_s1 + $0xd8] sm:$0xff]  ;;  %v1699_v23 = vld [vmem:[%s2227_s1 + $0xd0] sm:$0xff] }
   0x8   :  { %906 = vmatpush.bf16.msra.mxu3 %v1703_v6  ;;  %v1685_v15 = vld [vmem:[%s2227_s1 + $0x60] sm:$0xff]  ;;  %v1684_v19 = vld [vmem:[%s2227_s1 + $0x58] sm:$0xff]  ;;  %v1683_v24 = vld [vmem:[%s2227_s1 + $0x50] sm:$0xff] }
   0x9   :  { %880 = vmatpush.bf16.msra.mxu1 %v1687_v7  ;;  %v28_v21 = vld [vmem:[%s2226_s0] sm:$0xff] }
   0xa   :  { %868 = vmatpush.bf16.msra.mxu0 %v1678_v8  ;;  %235 = vst [vmem:[#allocation1] ss:$9 sm:$0xff] %v28_v21 }
   0xb   :  { %894 = vmatpush.bf16.msra.mxu2 %v1694_v9 }
   0xc   :  { %907 = vmatpush.bf16.msra.mxu3 %v1702_v10 }
   0xd   :  { %881 = vmatpush.bf16.msra.mxu1 %v1686_v11 }
   0xe   :  { %869 = vmatpush.bf16.msra.mxu0 %v1677_v12 }
   0xf   :  { %895 = vmatpush.bf16.msra.mxu2 %v1693_v13 }
  0x10   :  { %908 = vmatpush.bf16.msra.mxu3 %v1701_v14 }
  0x11   :  { %882 = vmatpush.bf16.msra.mxu1 %v1685_v15 }
  0x12   :  { %870 = vmatpush.bf16.msra.mxu0 %v1676_v16 }
  0x13   :  { %896 = vmatpush.bf16.msra.mxu2 %v1692_v17 }
  0x14   :  { %909 = vmatpush.bf16.msra.mxu3 %v1700_v18 }
  0x15   :  { %883 = vmatpush.bf16.msra.mxu1 %v1684_v19 }
  0x16   :  { %12 = vsyncpa [#allocation3], 0  ;;  %871 = vmatpush.bf16.msra.mxu0 %v1675_v20  ;;  %v1674_v25 = vld [vmem:[%s2227_s1 + $0x8] sm:$0xff]  ;;  %v1673_v29 = vld [vmem:[%s2227_s1] sm:$0xff]  ;;  %vm863_vm0 = vcmask 523264   ;;  %vm1105_vm1 = vcmask 1043456  }
  0x17   :  { %897 = vmatpush.bf16.msra.mxu2 %v1691_v22  ;;  %v1690_v26 = vld [vmem:[%s2227_s1 + $0x88] sm:$0xff]  ;;  %v1689_v30 = vld [vmem:[%s2227_s1 + $0x80] sm:$0xff]  ;;  %v1712_v32 = vld [vmem:[%s2227_s1 + $0x138] sm:$0xff]  ;;  %vm1176_vm2 = vcmask 1041408   ;;  %vm1101_vm3 = vcmask 982016   ;;  %vm1172_vm4 = vcmask 687104  }
  0x18   :  { %910 = vmatpush.bf16.msra.mxu3 %v1699_v23  ;;  %v1698_v27 = vld [vmem:[%s2227_s1 + $0xc8] sm:$0xff]  ;;  %v1697_v31 = vld [vmem:[%s2227_s1 + $0xc0] sm:$0xff]  ;;  %v1728_v33 = vld [vmem:[%s2227_s1 + $0x1b8] sm:$0xff]  ;;  %vm1193_vm5 = vcmask 74752   ;;  %s1213_s23 = sshll.u32 %s2233_s7, 4  ;;  %s1214_s23 = int_to_ptr.hbm [resolvable:$true] %s1213_s23 }
  0x19   :  { %884 = vmatpush.bf16.msra.mxu1 %v1683_v24  ;;  %v1682_v28 = vld [vmem:[%s2227_s1 + $0x48] sm:$0xff]  ;;  %v1736_v34 = vld [vmem:[%s2227_s1 + $0x1f8] sm:$0xff]  ;;  %v1681_v35 = vld [vmem:[%s2227_s1 + $0x40] sm:$0xff] }
  0x1a   :  { %872 = vmatpush.bf16.msra.mxu0 %v1674_v25  ;;  %v1720_v36 = vld [vmem:[%s2227_s1 + $0x178] sm:$0xff]  ;;  %v1711_v38 = vld [vmem:[%s2227_s1 + $0x130] sm:$0xff]  ;;  %v236_v39 = vld [vmem:[#allocation1] sm:$0xff] }
  0x1b   :  { %898 = vmatpush.bf16.msra.mxu2 %v1690_v26  ;;  %v238_v37 = vld [vmem:[#allocation1 + $0x12] sm:$0xff]  ;;  %v239_v42 = vld [vmem:[#allocation1 + $0x1b] sm:$0xff]  ;;  %v237_v44 = vld [vmem:[#allocation1 + $0x9] sm:$0xff] }
  0x1c   :  { %911 = vmatpush.bf16.msra.mxu3 %v1698_v27  ;;  %v1727_v40 = vld [vmem:[%s2227_s1 + $0x1b0] sm:$0xff]  ;;  %v1710_v45 = vld [vmem:[%s2227_s1 + $0x128] sm:$0xff]  ;;  %v243_v51 = vld [vmem:[#allocation1 + $0x3f] sm:$0xff] }
  0x1d   :  { %885 = vmatpush.bf16.msra.mxu1 %v1682_v28  ;;  %v1735_v41 = vld [vmem:[%s2227_s1 + $0x1f0] sm:$0xff]  ;;  %v1726_v46 = vld [vmem:[%s2227_s1 + $0x1a8] sm:$0xff]  ;;  %v1709_v54 = vld [vmem:[%s2227_s1 + $0x120] sm:$0xff] }
  0x1e   :  { %873 = vmatpush.bf16.msra.mxu0 %v1673_v29  ;;  %v1719_v43 = vld [vmem:[%s2227_s1 + $0x170] sm:$0xff]  ;;  %v1734_v47 = vld [vmem:[%s2227_s1 + $0x1e8] sm:$0xff]  ;;  %v1725_v55 = vld [vmem:[%s2227_s1 + $0x1a0] sm:$0xff] }
  0x1f   :  { %899 = vmatpush.bf16.msra.mxu2 %v1689_v30  ;;  %v1718_v48 = vld [vmem:[%s2227_s1 + $0x168] sm:$0xff]  ;;  %v242_v49 = vld [vmem:[#allocation1 + $0x36] sm:$0xff]  ;;  %v1733_v56 = vld [vmem:[%s2227_s1 + $0x1e0] sm:$0xff] }
  0x20   :  { %912 = vmatpush.bf16.msra.mxu3 %v1697_v31  ;;  %v240_v50 = vld [vmem:[#allocation1 + $0x24] sm:$0xff]  ;;  %v1998_v53 = vld [vmem:[#allocation1 + $0x2d] sm:$0xff]  ;;  %v1708_v58 = vld [vmem:[%s2227_s1 + $0x118] sm:$0xff] }
  0x21   :  { %886 = vmatpush.bf16.msra.mxu1 %v1681_v35  ;;  %874 = vmatmul.bf16.vlgmr.msra.gmra.mxu0 %v236_v39  ;;  %v29_v52 = vld [vmem:[%s2226_s0 + $0x8] sm:$0x1f]  ;;  %v1717_v57 = vld [vmem:[%s2227_s1 + $0x160] sm:$0xff]  ;;  %v1724_v59 = vld [vmem:[%s2227_s1 + $0x198] sm:$0xff] }
  0x22   :  { %918 = vmatpush.bf16.msrb.mxu0 %v1712_v32  ;;  %900 = vmatmul.bf16.vlgmr.msra.gmra.mxu2 %v238_v37  ;;  %245 = vst [vmem:[#allocation1] ss:$9 sm:$0xff] %v29_v52  ;;  %v1732_v60 = vld [vmem:[%s2227_s1 + $0x1d8] sm:$0xff]  ;;  %v1707_v62 = vld [vmem:[%s2227_s1 + $0x110] sm:$0xff]  ;;  %v1706_v2 = vld [vmem:[%s2227_s1 + $0x108] sm:$0xff] }
  0x23   :  { %944 = vmatpush.bf16.msrb.mxu2 %v1728_v33  ;;  %913 = vmatmul.bf16.vlgmr.msra.gmra.mxu3 %v239_v42  ;;  %v1716_v61 = vld [vmem:[%s2227_s1 + $0x158] sm:$0xff]  ;;  %v1723_v63 = vld [vmem:[%s2227_s1 + $0x190] sm:$0xff]  ;;  %v1722_v3 = vld [vmem:[%s2227_s1 + $0x188] sm:$0xff] }
  0x24   :  { %957 = vmatpush.bf16.msrb.mxu3 %v1736_v34  ;;  %887 = vmatmul.bf16.vlgmr.msra.gmra.mxu1 %v237_v44  ;;  %v1731_v0 = vld [vmem:[%s2227_s1 + $0x1d0] sm:$0xff]  ;;  %v1730_v4 = vld [vmem:[%s2227_s1 + $0x1c8] sm:$0xff]  ;;  %v1705_v6 = vld [vmem:[%s2227_s1 + $0x100] sm:$0xff] }
  0x25   :  { %931 = vmatpush.bf16.msrb.mxu1 %v1720_v36  ;;  %v1715_v1 = vld [vmem:[%s2227_s1 + $0x150] sm:$0xff]  ;;  %v1714_v5 = vld [vmem:[%s2227_s1 + $0x148] sm:$0xff]  ;;  %v1721_v7 = vld [vmem:[%s2227_s1 + $0x180] sm:$0xff] }
  0x26   :  { %919 = vmatpush.bf16.msrb.mxu0 %v1711_v38  ;;  %v1729_v8 = vld [vmem:[%s2227_s1 + $0x1c0] sm:$0xff]  ;;  %v1744_v9 = vld [vmem:[%s2227_s1 + $0x238] sm:$0xff]  ;;  %v1743_v14 = vld [vmem:[%s2227_s1 + $0x230] sm:$0xff] }
  0x27   :  { %945 = vmatpush.bf16.msrb.mxu2 %v1727_v40  ;;  %v1760_v10 = vld [vmem:[%s2227_s1 + $0x2b8] sm:$0xff]  ;;  %v1713_v12 = vld [vmem:[%s2227_s1 + $0x140] sm:$0xff]  ;;  %v1759_v15 = vld [vmem:[%s2227_s1 + $0x2b0] sm:$0xff] }
  0x28   :  { %958 = vmatpush.bf16.msrb.mxu3 %v1735_v41  ;;  %v1768_v11 = vld [vmem:[%s2227_s1 + $0x2f8] sm:$0xff]  ;;  %v1767_v16 = vld [vmem:[%s2227_s1 + $0x2f0] sm:$0xff]  ;;  %v1742_v18 = vld [vmem:[%s2227_s1 + $0x228] sm:$0xff] }
  0x29   :  { %932 = vmatpush.bf16.msrb.mxu1 %v1719_v43  ;;  %v1752_v13 = vld [vmem:[%s2227_s1 + $0x278] sm:$0xff]  ;;  %v1751_v17 = vld [vmem:[%s2227_s1 + $0x270] sm:$0xff]  ;;  %v1758_v19 = vld [vmem:[%s2227_s1 + $0x2a8] sm:$0xff] }
  0x2a   :  { %920 = vmatpush.bf16.msrb.mxu0 %v1710_v45  ;;  %v1766_v20 = vld [vmem:[%s2227_s1 + $0x2e8] sm:$0xff]  ;;  %v1741_v22 = vld [vmem:[%s2227_s1 + $0x220] sm:$0xff]  ;;  %v1740_v26 = vld [vmem:[%s2227_s1 + $0x218] sm:$0xff] }
  0x2b   :  { %946 = vmatpush.bf16.msrb.mxu2 %v1726_v46  ;;  %v1750_v21 = vld [vmem:[%s2227_s1 + $0x268] sm:$0xff]  ;;  %v1757_v23 = vld [vmem:[%s2227_s1 + $0x2a0] sm:$0xff]  ;;  %v1756_v27 = vld [vmem:[%s2227_s1 + $0x298] sm:$0xff] }
  0x2c   :  { %959 = vmatpush.bf16.msrb.mxu3 %v1734_v47  ;;  %v1765_v24 = vld [vmem:[%s2227_s1 + $0x2e0] sm:$0xff]  ;;  %v1764_v28 = vld [vmem:[%s2227_s1 + $0x2d8] sm:$0xff]  ;;  %v1739_v30 = vld [vmem:[%s2227_s1 + $0x210] sm:$0xff] }
  0x2d   :  { %933 = vmatpush.bf16.msrb.mxu1 %v1718_v48  ;;  %v1749_v25 = vld [vmem:[%s2227_s1 + $0x260] sm:$0xff]  ;;  %v1748_v29 = vld [vmem:[%s2227_s1 + $0x258] sm:$0xff]  ;;  %v1755_v31 = vld [vmem:[%s2227_s1 + $0x290] sm:$0xff] }
  0x2e   :  { %921 = vmatpush.bf16.msrb.mxu0 %v1709_v54  ;;  %v1763_v32 = vld [vmem:[%s2227_s1 + $0x2d0] sm:$0xff]  ;;  %v1738_v34 = vld [vmem:[%s2227_s1 + $0x208] sm:$0xff]  ;;  %v1737_v38 = vld [vmem:[%s2227_s1 + $0x200] sm:$0xff] }
  0x2f   :  { %947 = vmatpush.bf16.msrb.mxu2 %v1725_v55  ;;  %v1747_v33 = vld [vmem:[%s2227_s1 + $0x250] sm:$0xff]  ;;  %v1754_v35 = vld [vmem:[%s2227_s1 + $0x288] sm:$0xff]  ;;  %v1753_v39 = vld [vmem:[%s2227_s1 + $0x280] sm:$0xff] }
  0x30   :  { %960 = vmatpush.bf16.msrb.mxu3 %v1733_v56  ;;  %v1762_v36 = vld [vmem:[%s2227_s1 + $0x2c8] sm:$0xff]  ;;  %v1761_v40 = vld [vmem:[%s2227_s1 + $0x2c0] sm:$0xff]  ;;  %v1772_v41 = vld [vmem:[%s2227_s1 + $0x318] sm:$0xff] }
  0x31   :  { %934 = vmatpush.bf16.msrb.mxu1 %v1717_v57  ;;  %v1746_v37 = vld [vmem:[%s2227_s1 + $0x248] sm:$0xff]  ;;  %v1745_v42 = vld [vmem:[%s2227_s1 + $0x240] sm:$0xff]  ;;  %v248_v44 = vld [vmem:[#allocation1 + $0x12] sm:$0xff] }
  0x32   :  { %922 = vmatpush.bf16.msrb.mxu0 %v1708_v58  ;;  %v246_v43 = vld [vmem:[#allocation1] sm:$0xff]  ;;  %v1771_v46 = vld [vmem:[%s2227_s1 + $0x310] sm:$0xff]  ;;  %v1770_v48 = vld [vmem:[%s2227_s1 + $0x308] sm:$0xff] }
  0x33   :  { %948 = vmatpush.bf16.msrb.mxu2 %v1724_v59  ;;  %v249_v45 = vld [vmem:[#allocation1 + $0x1b] sm:$0xff]  ;;  %v247_v47 = vld [vmem:[#allocation1 + $0x9] sm:$0xff] }
  0x34   :  { %961 = vmatpush.bf16.msrb.mxu3 %v1732_v60  ;;  %v1051_v54 = vld [vmem:[%s2229_s3 + $0x38] sm:$0xf] }
  0x35   :  { %935 = vmatpush.bf16.msrb.mxu1 %v1716_v61  ;;  %v1085_v56 = vunpack.c.l.b16 %v1051_v54  ;;  %v1779_v61 = vld [vmem:[%s2229_s3 + $0x30] sm:$0xff] }
  0x36   :  { %923 = vmatpush.bf16.msrb.mxu0 %v1707_v62 }
  0x37   :  { %949 = vmatpush.bf16.msrb.mxu2 %v1723_v63  ;;  %v1093_v58 = vpack.c.b16 %v1085_v56, %v1085_v56 }
  0x38   :  { %962 = vmatpush.bf16.msrb.mxu3 %v1731_v0  ;;  %v1778_v0 = vld [vmem:[%s2229_s3 + $0x28] sm:$0xff] }
  0x39   :  { %936 = vmatpush.bf16.msrb.mxu1 %v1715_v1  ;;  %v1107_v60 = vsel %vm1105_vm1, %v1093_v58, 0  ;;  %v1786_v1 = vld [vmem:[%s2228_s2] ss:$0 sm:$0xff] }
  0x3a   :  { %924 = vmatpush.bf16.msrb.mxu0 %v1706_v2  ;;  %v1777_v2 = vld [vmem:[%s2229_s3 + $0x20] sm:$0xff] }
  0x3b   :  { %950 = vmatpush.bf16.msrb.mxu2 %v1722_v3 }
  0x3c   :  { %963 = vmatpush.bf16.msrb.mxu3 %v1730_v4 }
  0x3d   :  { %937 = vmatpush.bf16.msrb.mxu1 %v1714_v5 }
  0x3e   :  { %925 = vmatpush.bf16.msrb.mxu0 %v1705_v6  ;;  %v1776_v6 = vld [vmem:[%s2229_s3 + $0x18] sm:$0xff] }
  0x3f   :  { %951 = vmatpush.bf16.msrb.mxu2 %v1721_v7 }
  0x40   :  { %964 = vmatpush.bf16.msrb.mxu3 %v1729_v8 }
  0x41   :  { %938 = vmatpush.bf16.msrb.mxu1 %v1713_v12  ;;  %926 = vmatmul.bf16.vlgmr.msrb.gmra.mxu0 %v240_v50  ;;  %v250_v50 = vld [vmem:[#allocation1 + $0x24] sm:$0xff] }
  0x42   :  { %970 = vmatpush.bf16.msra.mxu0 %v1744_v9  ;;  %952 = vmatmul.bf16.vlgmr.msrb.gmra.mxu2 %v242_v49  ;;  %v1769_v49 = vld [vmem:[%s2227_s1 + $0x300] sm:$0xff]  ;;  %v1775_v9 = vld [vmem:[%s2229_s3 + $0x10] sm:$0xff] }
  0x43   :  { %996 = vmatpush.bf16.msra.mxu2 %v1760_v10  ;;  %965 = vmatmul.bf16.vlgmr.msrb.gmra.mxu3 %v243_v51 }
  0x44   :  { %1009 = vmatpush.bf16.msra.mxu3 %v1768_v11  ;;  %939 = vmatmul.bf16.vlgmr.msrb.gmra.mxu1 %v1998_v53 }
  0x45   :  { %983 = vmatpush.bf16.msra.mxu1 %v1752_v13 }
  0x46   :  { %971 = vmatpush.bf16.msra.mxu0 %v1743_v14  ;;  %v1774_v14 = vld [vmem:[%s2229_s3 + $0x8] sm:$0xff] }
  0x47   :  { %997 = vmatpush.bf16.msra.mxu2 %v1759_v15 }
  0x48   :  { %1010 = vmatpush.bf16.msra.mxu3 %v1767_v16 }
  0x49   :  { %984 = vmatpush.bf16.msra.mxu1 %v1751_v17 }
  0x4a   :  { %972 = vmatpush.bf16.msra.mxu0 %v1742_v18  ;;  %v1773_v18 = vld [vmem:[%s2229_s3] sm:$0xff] }
  0x4b   :  { %998 = vmatpush.bf16.msra.mxu2 %v1758_v19 }
  0x4c   :  { %1011 = vmatpush.bf16.msra.mxu3 %v1766_v20  ;;  %v1134_v20 = vld [vmem:[%s2231_s5 + $0x28] sm:$0x3] }
  0x4d   :  { %985 = vmatpush.bf16.msra.mxu1 %v1750_v21  ;;  %v1160_v21 = vunpack.c.l.b16 %v1134_v20 }
  0x4e   :  { %973 = vmatpush.bf16.msra.mxu0 %v1741_v22 }
  0x4f   :  { %999 = vmatpush.bf16.msra.mxu2 %v1757_v23  ;;  %v1166_v23 = vpack.c.b16 %v1160_v21, %v1160_v21 }
  0x50   :  { %1012 = vmatpush.bf16.msra.mxu3 %v1765_v24 }
  0x51   :  { %986 = vmatpush.bf16.msra.mxu1 %v1749_v25  ;;  %v1178_v24 = vsel %vm1176_vm2, %v1166_v23, 0  ;;  %v1784_v25 = vld [vmem:[%s2231_s5 + $0x20] sm:$0xff] }
  0x52   :  { %974 = vmatpush.bf16.msra.mxu0 %v1740_v26 }
  0x53   :  { %1000 = vmatpush.bf16.msra.mxu2 %v1756_v27 }
  0x54   :  { %1013 = vmatpush.bf16.msra.mxu3 %v1764_v28 }
  0x55   :  { %987 = vmatpush.bf16.msra.mxu1 %v1748_v29  ;;  %v1783_v29 = vld [vmem:[%s2231_s5 + $0x18] sm:$0xff] }
  0x56   :  { %975 = vmatpush.bf16.msra.mxu0 %v1739_v30 }
  0x57   :  { %1001 = vmatpush.bf16.msra.mxu2 %v1755_v31 }
  0x58   :  { %1014 = vmatpush.bf16.msra.mxu3 %v1763_v32 }
  0x59   :  { %988 = vmatpush.bf16.msra.mxu1 %v1747_v33  ;;  %v1782_v33 = vld [vmem:[%s2231_s5 + $0x10] sm:$0xff] }
  0x5a   :  { %976 = vmatpush.bf16.msra.mxu0 %v1738_v34 }
  0x5b   :  { %1002 = vmatpush.bf16.msra.mxu2 %v1754_v35 }
  0x5c   :  { %1015 = vmatpush.bf16.msra.mxu3 %v1762_v36 }
  0x5d   :  { %989 = vmatpush.bf16.msra.mxu1 %v1746_v37 }
  0x5e   :  { %977 = vmatpush.bf16.msra.mxu0 %v1737_v38 }
  0x5f   :  { %1003 = vmatpush.bf16.msra.mxu2 %v1753_v39 }
  0x60   :  { %1016 = vmatpush.bf16.msra.mxu3 %v1761_v40 }
  0x61   :  { %990 = vmatpush.bf16.msra.mxu1 %v1745_v42  ;;  %978 = vmatmul.bf16.vlgmr.msra.gmra.mxu0 %v246_v43 }
  0x62   :  { %1026 = vmatpush.bf16.msrb.mxu0 %v1772_v41  ;;  %1004 = vmatmul.bf16.vlgmr.msra.gmra.mxu2 %v248_v44 }
  0x63   :  { %1017 = vmatmul.bf16.vlgmr.msra.gmra.mxu3 %v249_v45  ;;  %1182 = vmatpush.bf16.msrb.mxu2 %v1178_v24 }
  0x64   :  { %991 = vmatmul.bf16.vlgmr.msra.gmra.mxu1 %v247_v47  ;;  %v1781_v47 = vld [vmem:[%s2231_s5 + $0x8] sm:$0xff] }
  0x65   :  { %1109 = vmatpush.bf16.msrb.mxu1 %v1107_v60 }
  0x66   :  { %1027 = vmatpush.bf16.msrb.mxu0 %v1771_v46 }
  0x67   :  { %1183 = vmatpush.bf16.msrb.mxu2 %v1784_v25 }
  0x69   :  { %1110 = vmatpush.bf16.msrb.mxu1 %v1779_v61 }
  0x6a   :  { %1028 = vmatpush.bf16.msrb.mxu0 %v1770_v48  ;;  %v1780_v48 = vld [vmem:[%s2231_s5] sm:$0xff] }
  0x6b   :  { %1184 = vmatpush.bf16.msrb.mxu2 %v1783_v29 }
  0x6d   :  { %1111 = vmatpush.bf16.msrb.mxu1 %v1778_v0 }
  0x6e   :  { %1029 = vmatpush.bf16.msrb.mxu0 %v1769_v49  ;;  %v1787_v49 = vld [vmem:[%s2230_s4] ss:$0 sm:$0xff]  ;;  %s1819_s4 = smov [#allocation2]  }
  0x6f   :  { %1185 = vmatpush.bf16.msrb.mxu2 %v1782_v33  ;;  %s1211_s5 = sshll.u32 %s1819_s4, 4  ;;  %s1212_s5 = int_to_ptr.vmem [resolvable:$true] %s1211_s5 }
  0x71   :  { %1622 = vmatmul.msk.bf16.vlgmr.msrb.gmra.mxu0 %vm863_vm0, %v250_v50  ;;  %1112 = vmatpush.bf16.msrb.mxu1 %v1777_v2 }
  0x73   :  { %1186 = vmatpush.bf16.msrb.mxu2 %v1781_v47 }
  0x75   :  { %1113 = vmatpush.bf16.msrb.mxu1 %v1776_v6 }
  0x77   :  { %1187 = vmatpush.bf16.msrb.mxu2 %v1780_v48 }
  0x79   :  { %1114 = vmatpush.bf16.msrb.mxu1 %v1775_v9 }
  0x7d   :  { %1115 = vmatpush.bf16.msrb.mxu1 %v1774_v14 }
  0x81   :  { %1116 = vmatpush.bf16.msrb.mxu1 %v1773_v18 }
  0x9e   :  { %v875_v51 = vpop.f32.mrf.mxu0 }
  0x9f   :  { %v876_v5 = vadd.f32 %v1786_v1, %v875_v51 }
  0xa1   :  { %v888_v52 = vpop.f32.mrf.mxu1 }
  0xa2   :  { %v889_v10 = vadd.f32 %v888_v52, %v876_v5 }
  0xa5   :  { %v901_v53 = vpop.f32.mrf.mxu2 }
  0xa6   :  { %v914_v55 = vpop.f32.mrf.mxu3  ;;  %v877_v57 = vpop.f32.mrf.mxu0  ;;  %v902_v13 = vadd.f32 %v901_v53, %v889_v10 }
  0xa8   :  { %v915_v17 = vadd.f32 %v914_v55, %v902_v13  ;;  %v1788_v55 = vld [vmem:[%s2232_s6] ss:$0 sm:$0xff] }
  0xa9   :  { %v890_v59 = vpop.f32.mrf.mxu1 }
  0xad   :  { %v903_v62 = vpop.f32.mrf.mxu2 }
  0xae   :  { %v916_v63 = vpop.f32.mrf.mxu3 }
  0xbe   :  { %v927_v3 = vpop.f32.mrf.mxu0 }
  0xbf   :  { %v928_v19 = vadd.f32 %v927_v3, %v915_v17 }
  0xc1   :  { %v940_v4 = vpop.f32.mrf.mxu1 }
  0xc2   :  { %v941_v22 = vadd.f32 %v940_v4, %v928_v19 }
  0xc5   :  { %v953_v7 = vpop.f32.mrf.mxu2 }
  0xc6   :  { %v966_v8 = vpop.f32.mrf.mxu3  ;;  %v929_v11 = vpop.f32.mrf.mxu0  ;;  %v954_v26 = vadd.f32 %v953_v7, %v941_v22 }
  0xc8   :  { %v967_v30 = vadd.f32 %v966_v8, %v954_v26 }
  0xc9   :  { %v942_v12 = vpop.f32.mrf.mxu1 }
  0xcd   :  { %v955_v15 = vpop.f32.mrf.mxu2 }
  0xce   :  { %v968_v16 = vpop.f32.mrf.mxu3 }
  0xde   :  { %v979_v27 = vpop.f32.mrf.mxu0 }
  0xdf   :  { %v980_v31 = vadd.f32 %v979_v27, %v967_v30 }
  0xe1   :  { %v992_v28 = vpop.f32.mrf.mxu1 }
  0xe2   :  { %v993_v36 = vadd.f32 %v992_v28, %v980_v31 }
  0xe5   :  { %v1005_v32 = vpop.f32.mrf.mxu2 }
  0xe6   :  { %v1018_v34 = vpop.f32.mrf.mxu3  ;;  %v981_v35 = vpop.f32.mrf.mxu0  ;;  %v1006_v38 = vadd.f32 %v1005_v32, %v993_v36 }
  0xe8   :  { %v1019_v40 = vadd.f32 %v1018_v34, %v1006_v38 }
  0xe9   :  { %v994_v37 = vpop.f32.mrf.mxu1 }
  0xed   :  { %v1007_v39 = vpop.f32.mrf.mxu2 }
  0xee   :  { %v1020_v41 = vpop.f32.mrf.mxu3  ;;  %v1031_v42 = vpop.f32.mrf.mxu0 }
  0xef   :  { %v1032_v43 = vadd.f32 %v1031_v42, %v1019_v40 }
  0xf1   :  { %v1035_v44 = vmax.f32 %v1032_v43, 0.0 }
  0xf3   :  { %v1036_v45 = vpack.c.bf16 %v1035_v44, %v1035_v44 }
  0xf5   :  { %1651 = vmatmul.msk.bf16.vlgmr.msrb.gmra.mxu1 %vm1101_vm3, %v1036_v45 }
  0xf6   :  { %v1033_v46 = vpop.f32.mrf.mxu0 }
 0x172   :  { %v1118_v50 = vpop.f32.mrf.mxu1 }
 0x173   :  { %v1119_v51 = vadd.f32 %v1787_v49, %v1118_v50 }
 0x175   :  { %v1122_v52 = vmax.f32 %v1119_v51, 0.0 }
 0x177   :  { %v1123_v53 = vpack.c.bf16 %v1122_v52, %v1122_v52 }
 0x179   :  { %1672 = vmatmul.msk.bf16.vlgmr.msrb.gmra.mxu2 %vm1172_vm4, %v1123_v53 }
 0x17a   :  { %v1120_v54 = vpop.f32.mrf.mxu1 }
 0x1fc   :  { %v1189_v56 = vpop.f32.mrf.mxu2 }
 0x1fd   :  { %v1190_v57 = vadd.f32 %v1788_v55, %v1189_v56 }
 0x1ff   :  { %v1194_v58 = vsel %vm1193_vm5, %v1190_v57, -inf }
 0x200   :  { %1195 = vmax.xlane.f32.xlu0 %v1194_v58 }
 0x204   :  { %v1191_v59 = vpop.f32.mrf.mxu2 }
 0x273   :  { %v1196_v60 = vpop.xlane.xlu0 %1195 }
 0x274   :  { %v1197_v61 = vsub.f32 %v1190_v57, %v1196_v60 }
 0x276   :  { %v1198_v62 = vmul.f32 1.442695, %v1197_v61 }
 0x278   :  { %1789 = vpow2.f32 %v1198_v62 }
 0x27e   :  { %v1790_v63 = vpop.eup %1789 }
 0x27f   :  { %v1200_v0 = vsel %vm1193_vm5, %v1790_v63, 0.0 }
 0x280   :  { %1201 = vadd.xlane.f32.xlu0 %v1200_v0 }
 0x2f3   :  { %v1202_v1 = vpop.xlane.xlu0 %1201 }
 0x2f4   :  { %1791 = vrcp.f32 %v1202_v1 }
 0x2fa   :  { %v1792_v2 = vpop.eup %1791 }
 0x2fb   :  { %v1204_v3 = vmul.f32 %v1792_v2, %v1790_v63 }
 0x2fd   :  { %1205 = vst.msk [vmem:[#allocation2] sm:$0x3] %vm1193_vm5, %v1204_v3 }
 0x2fe   :  { %1216 = dma.vmem_to_hbm [thread:$0]  %s1212_s5, 32, %s1214_s23, [#allocation3]  }
 0x2ff   :  { %1817 = dma.done.wait [#allocation3], 32  }
 0x300   :  { %1818 = vsyncadd [#allocation3], 4294967264 }
 0x301   :  { %1221 = vsyncpa [#allocation3], 1 }

</bundles_post_ra>
